<compile_context>
chip_gen: v5e
topology: v5e:2x2
jax: 0.10.0
libtpu: 0.0.40
codegen_flags: <defaults>
</compile_context>

<pallas_src>
import jax
import jax.numpy as jnp
import numpy as np
from jax.experimental import pallas as pl
from jax.experimental.pallas import tpu as pltpu


# ----------------------------- Pallas kernels --------------------------------
def _conv3x3_kernel(x_ref, w_ref, out_ref):
    """3x3, stride-1, pre-padded conv for one batch element.

    x_ref:   (1, H+2, W+2, Cin)  VMEM
    w_ref:   (9, Cin, Cout)      VMEM (tap-major weights)
    out_ref: (1, H, W, Cout)     VMEM
    """
    H = out_ref.shape[1]
    W = out_ref.shape[2]
    Cin = w_ref.shape[1]
    Cout = w_ref.shape[2]

    x = x_ref[0]  # (H+2, W+2, Cin), channels on lanes
    acc = jnp.zeros((H * W, Cout), dtype=jnp.float32)
    for tap in range(9):  # static unrolled loop over the 3x3 taps
        dh, dw = divmod(tap, 3)
        patch = x[dh:dh + H, dw:dw + W, :].reshape(H * W, Cin)
        acc = acc + jnp.dot(patch, w_ref[tap],
                            preferred_element_type=jnp.float32)
    out_ref[...] = acc.reshape(1, H, W, Cout).astype(out_ref.dtype)


def _bn_relu_kernel(x_ref, scale_ref, bias_ref, out_ref):
    """Fused per-channel affine (folded BatchNorm) + ReLU.

    x_ref:     (1, H, W, C)
    scale_ref: (1, 1, 1, C)
    bias_ref:  (1, 1, 1, C)
    """
    y = x_ref[...] * scale_ref[...] + bias_ref[...]
    out_ref[...] = jnp.maximum(y, 0.0).astype(out_ref.dtype)


# ------------------------------ wrappers --------------------------------------
def _conv3x3(x_nhwc, w_tap):
    """x_nhwc: (N,H,W,Cin) f32; w_tap: (9,Cin,Cout) f32 -> (N,H,W,Cout) f32."""
    N, H, W, Cin = x_nhwc.shape
    Cout = w_tap.shape[-1]
    x_pad = jnp.pad(x_nhwc, ((0, 0), (1, 1), (1, 1), (0, 0)))
    return pl.pallas_call(
        _conv3x3_kernel,
        out_shape=jax.ShapeDtypeStruct((N, H, W, Cout), jnp.float32),
        grid_spec=pltpu.PrefetchScalarGridSpec(
            num_scalar_prefetch=0,
            grid=(N,),
            in_specs=[
                pl.BlockSpec((1, H + 2, W + 2, Cin), lambda n: (n, 0, 0, 0)),
                pl.BlockSpec((9, Cin, Cout), lambda n: (0, 0, 0)),
            ],
            out_specs=pl.BlockSpec((1, H, W, Cout), lambda n: (n, 0, 0, 0)),
        ),
        compiler_params=pltpu.CompilerParams(
            dimension_semantics=("parallel",)),
    )(x_pad, w_tap)


def _bn_relu(x_nhwc, scale, bias):
    """x_nhwc: (N,H,W,C); scale/bias: (C,) folded BN affine -> (N,H,W,C)."""
    N, H, W, C = x_nhwc.shape
    scale4 = scale.reshape(1, 1, 1, C).astype(jnp.float32)
    bias4 = bias.reshape(1, 1, 1, C).astype(jnp.float32)
    return pl.pallas_call(
        _bn_relu_kernel,
        out_shape=jax.ShapeDtypeStruct((N, H, W, C), jnp.float32),
        grid_spec=pltpu.PrefetchScalarGridSpec(
            num_scalar_prefetch=0,
            grid=(N,),
            in_specs=[
                pl.BlockSpec((1, H, W, C), lambda n: (n, 0, 0, 0)),
                pl.BlockSpec((1, 1, 1, C), lambda n: (0, 0, 0, 0)),
                pl.BlockSpec((1, 1, 1, C), lambda n: (0, 0, 0, 0)),
            ],
            out_specs=pl.BlockSpec((1, H, W, C), lambda n: (n, 0, 0, 0)),
        ),
        compiler_params=pltpu.CompilerParams(
            dimension_semantics=("parallel",)),
    )(x_nhwc, scale4, bias4)


def pillar_block_forward(x_nchw, layer_params, eps=1e-5):
    """Pallas implementation of PillarBlock.forward (training-mode BatchNorm).

    x_nchw:       (N, Cin, H, W) float32
    layer_params: list of (conv_weight (Cout,Cin,3,3), gamma (Cout,), beta (Cout,))
    Returns (N, Cout, H, W) float32 (NCHW, like the PyTorch module).
    """
    y = jnp.transpose(x_nchw, (0, 2, 3, 1)).astype(jnp.float32)  # NCHW -> NHWC
    for w, gamma, beta in layer_params:
        Cout, Cin, kh, kw = w.shape
        assert (kh, kw) == (3, 3)
        # (Cout, Cin, 3, 3) -> (3, 3, Cin, Cout) -> (9, Cin, Cout)
        w_tap = jnp.transpose(w, (2, 3, 1, 0)).reshape(kh * kw, Cin, Cout)
        w_tap = w_tap.astype(jnp.float32)

        conv = _conv3x3(y, w_tap)

        # BatchNorm2d, training-mode: normalize with batch statistics (biased var).
        mean = jnp.mean(conv, axis=(0, 1, 2))
        var = jnp.var(conv, axis=(0, 1, 2))
        scale = gamma.astype(jnp.float32) * jax.lax.rsqrt(var + eps)
        bias = beta.astype(jnp.float32) - mean * scale

        y = _bn_relu(conv, scale, bias)
    return jnp.transpose(y, (0, 3, 1, 2))  # NHWC -> NCHW


# ---------------- pure-JAX reference (for correctness check) -----------------
def pillar_block_ref(x_nchw, layer_params, eps=1e-5):
    y = x_nchw.astype(jnp.float32)
    for w, gamma, beta in layer_params:
        y = jax.lax.conv_general_dilated(
            y, w.astype(jnp.float32),
            window_strides=(1, 1), padding=((1, 1), (1, 1)),
            dimension_numbers=("NCHW", "OIHW", "NCHW"),
            precision=jax.lax.Precision.HIGHEST)
        mean = jnp.mean(y, axis=(0, 2, 3), keepdims=True)
        var = jnp.var(y, axis=(0, 2, 3), keepdims=True)
        y = (y - mean) * jax.lax.rsqrt(var + eps)
        y = y * gamma.reshape(1, -1, 1, 1) + beta.reshape(1, -1, 1, 1)
        y = jnp.maximum(y, 0.0)
    return y


if __name__ == "__main__":
    key = jax.random.PRNGKey(0)
    N, C_IN, H, W = 2, 64, 16, 16
    DIMS = 64
    NUM_LAYERS = 2  # exercises the Sequential stack; layer-1 default stride=1

    keys = jax.random.split(key, 1 + 3 * NUM_LAYERS)
    x = jax.random.normal(keys[0], (N, C_IN, H, W), dtype=jnp.float32)

    layer_params = []
    cin = C_IN
    for i in range(NUM_LAYERS):
        w = 0.05 * jax.random.normal(keys[1 + 3 * i], (DIMS, cin, 3, 3),
                                     dtype=jnp.float32)
        gamma = 1.0 + 0.1 * jax.random.normal(keys[2 + 3 * i], (DIMS,),
                                              dtype=jnp.float32)
        beta = 0.1 * jax.random.normal(keys[3 + 3 * i], (DIMS,),
                                       dtype=jnp.float32)
        layer_params.append((w, gamma, beta))
        cin = DIMS

    out = pillar_block_forward(x, layer_params)
    jax.block_until_ready(out)

    ref = pillar_block_ref(x, layer_params)
    np.testing.assert_allclose(np.asarray(out), np.asarray(ref),
                               rtol=3e-2, atol=3e-2)
    print("KERNEL_OK")
</pallas_src>

<mosaic_0001>
module attributes {stable_mosaic.version = 11 : i64} {
  func.func @_conv3x3_kernel(%arg0: i32, %arg1: memref<1x18x18x64xf32, #tpu.memory_space<vmem>>, %arg2: memref<9x64x64xf32, #tpu.memory_space<vmem>>, %arg3: memref<1x16x16x64xf32, #tpu.memory_space<vmem>>) attributes {dimension_semantics = [#tpu.dimension_semantics<parallel>], iteration_bounds = array<i64: 2>, scalar_prefetch = 0 : i64, scratch_operands = 0 : i64, tpu.core_type = #tpu.core_type<tc>, window_params = [{transform_indices = @transform_0, window_bounds = array<i64: 1, 18, 18, 64>}, {pipeline_mode = #tpu.pipeline_mode<synchronous>, transform_indices = @transform_1, window_bounds = array<i64: 9, 64, 64>}, {transform_indices = @transform_2, window_bounds = array<i64: 1, 16, 16, 64>}]} {
    %c0 = arith.constant 0 : index
    %c0_0 = arith.constant 0 : index
    %c0_1 = arith.constant 0 : index
    %c0_2 = arith.constant 0 : index
    %0 = vector.load %arg1[%c0, %c0_0, %c0_1, %c0_2] : memref<1x18x18x64xf32, #tpu.memory_space<vmem>>, vector<1x18x18x64xf32>
    %1 = vector.shape_cast %0 : vector<1x18x18x64xf32> to vector<18x18x64xf32>
    %cst = arith.constant 0.000000e+00 : f32
    %2 = vector.broadcast %cst : f32 to vector<256x64xf32>
    %3 = vector.extract_strided_slice %1 {offsets = [0, 0, 0], sizes = [16, 16, 64], strides = [1, 1, 1]} : vector<18x18x64xf32> to vector<16x16x64xf32>
    %4 = vector.shape_cast %3 : vector<16x16x64xf32> to vector<256x64xf32>
    %c0_3 = arith.constant 0 : index
    %c0_4 = arith.constant 0 : index
    %c0_5 = arith.constant 0 : index
    %5 = vector.load %arg2[%c0_3, %c0_4, %c0_5] : memref<9x64x64xf32, #tpu.memory_space<vmem>>, vector<1x64x64xf32>
    %6 = vector.shape_cast %5 : vector<1x64x64xf32> to vector<64x64xf32>
    %cst_6 = arith.constant dense<0.000000e+00> : vector<256x64xf32>
    %7 = tpu.matmul %4, %6, %cst_6 {dimension_numbers = #tpu.dot_dimension_numbers<[1], [0], [0], [1], [0, 0, 1, 1], [], []>} : vector<256x64xf32>, vector<64x64xf32>, vector<256x64xf32> -> vector<256x64xf32>
    %8 = arith.addf %2, %7 : vector<256x64xf32>
    %9 = vector.extract_strided_slice %1 {offsets = [0, 1, 0], sizes = [16, 16, 64], strides = [1, 1, 1]} : vector<18x18x64xf32> to vector<16x16x64xf32>
    %10 = vector.shape_cast %9 : vector<16x16x64xf32> to vector<256x64xf32>
    %c1 = arith.constant 1 : index
    %c0_7 = arith.constant 0 : index
    %c0_8 = arith.constant 0 : index
    %11 = vector.load %arg2[%c1, %c0_7, %c0_8] : memref<9x64x64xf32, #tpu.memory_space<vmem>>, vector<1x64x64xf32>
    %12 = vector.shape_cast %11 : vector<1x64x64xf32> to vector<64x64xf32>
    %cst_9 = arith.constant dense<0.000000e+00> : vector<256x64xf32>
    %13 = tpu.matmul %10, %12, %cst_9 {dimension_numbers = #tpu.dot_dimension_numbers<[1], [0], [0], [1], [0, 0, 1, 1], [], []>} : vector<256x64xf32>, vector<64x64xf32>, vector<256x64xf32> -> vector<256x64xf32>
    %14 = arith.addf %8, %13 : vector<256x64xf32>
    %15 = vector.extract_strided_slice %1 {offsets = [0, 2, 0], sizes = [16, 16, 64], strides = [1, 1, 1]} : vector<18x18x64xf32> to vector<16x16x64xf32>
    %16 = vector.shape_cast %15 : vector<16x16x64xf32> to vector<256x64xf32>
    %c2 = arith.constant 2 : index
    %c0_10 = arith.constant 0 : index
    %c0_11 = arith.constant 0 : index
    %17 = vector.load %arg2[%c2, %c0_10, %c0_11] : memref<9x64x64xf32, #tpu.memory_space<vmem>>, vector<1x64x64xf32>
    %18 = vector.shape_cast %17 : vector<1x64x64xf32> to vector<64x64xf32>
    %cst_12 = arith.constant dense<0.000000e+00> : vector<256x64xf32>
    %19 = tpu.matmul %16, %18, %cst_12 {dimension_numbers = #tpu.dot_dimension_numbers<[1], [0], [0], [1], [0, 0, 1, 1], [], []>} : vector<256x64xf32>, vector<64x64xf32>, vector<256x64xf32> -> vector<256x64xf32>
    %20 = arith.addf %14, %19 : vector<256x64xf32>
    %21 = vector.extract_strided_slice %1 {offsets = [1, 0, 0], sizes = [16, 16, 64], strides = [1, 1, 1]} : vector<18x18x64xf32> to vector<16x16x64xf32>
    %22 = vector.shape_cast %21 : vector<16x16x64xf32> to vector<256x64xf32>
    %c3 = arith.constant 3 : index
    %c0_13 = arith.constant 0 : index
    %c0_14 = arith.constant 0 : index
    %23 = vector.load %arg2[%c3, %c0_13, %c0_14] : memref<9x64x64xf32, #tpu.memory_space<vmem>>, vector<1x64x64xf32>
    %24 = vector.shape_cast %23 : vector<1x64x64xf32> to vector<64x64xf32>
    %cst_15 = arith.constant dense<0.000000e+00> : vector<256x64xf32>
    %25 = tpu.matmul %22, %24, %cst_15 {dimension_numbers = #tpu.dot_dimension_numbers<[1], [0], [0], [1], [0, 0, 1, 1], [], []>} : vector<256x64xf32>, vector<64x64xf32>, vector<256x64xf32> -> vector<256x64xf32>
    %26 = arith.addf %20, %25 : vector<256x64xf32>
    %27 = vector.extract_strided_slice %1 {offsets = [1, 1, 0], sizes = [16, 16, 64], strides = [1, 1, 1]} : vector<18x18x64xf32> to vector<16x16x64xf32>
    %28 = vector.shape_cast %27 : vector<16x16x64xf32> to vector<256x64xf32>
    %c4 = arith.constant 4 : index
    %c0_16 = arith.constant 0 : index
    %c0_17 = arith.constant 0 : index
    %29 = vector.load %arg2[%c4, %c0_16, %c0_17] : memref<9x64x64xf32, #tpu.memory_space<vmem>>, vector<1x64x64xf32>
    %30 = vector.shape_cast %29 : vector<1x64x64xf32> to vector<64x64xf32>
    %cst_18 = arith.constant dense<0.000000e+00> : vector<256x64xf32>
    %31 = tpu.matmul %28, %30, %cst_18 {dimension_numbers = #tpu.dot_dimension_numbers<[1], [0], [0], [1], [0, 0, 1, 1], [], []>} : vector<256x64xf32>, vector<64x64xf32>, vector<256x64xf32> -> vector<256x64xf32>
    %32 = arith.addf %26, %31 : vector<256x64xf32>
    %33 = vector.extract_strided_slice %1 {offsets = [1, 2, 0], sizes = [16, 16, 64], strides = [1, 1, 1]} : vector<18x18x64xf32> to vector<16x16x64xf32>
    %34 = vector.shape_cast %33 : vector<16x16x64xf32> to vector<256x64xf32>
    %c5 = arith.constant 5 : index
    %c0_19 = arith.constant 0 : index
    %c0_20 = arith.constant 0 : index
    %35 = vector.load %arg2[%c5, %c0_19, %c0_20] : memref<9x64x64xf32, #tpu.memory_space<vmem>>, vector<1x64x64xf32>
    %36 = vector.shape_cast %35 : vector<1x64x64xf32> to vector<64x64xf32>
    %cst_21 = arith.constant dense<0.000000e+00> : vector<256x64xf32>
    %37 = tpu.matmul %34, %36, %cst_21 {dimension_numbers = #tpu.dot_dimension_numbers<[1], [0], [0], [1], [0, 0, 1, 1], [], []>} : vector<256x64xf32>, vector<64x64xf32>, vector<256x64xf32> -> vector<256x64xf32>
    %38 = arith.addf %32, %37 : vector<256x64xf32>
    %39 = vector.extract_strided_slice %1 {offsets = [2, 0, 0], sizes = [16, 16, 64], strides = [1, 1, 1]} : vector<18x18x64xf32> to vector<16x16x64xf32>
    %40 = vector.shape_cast %39 : vector<16x16x64xf32> to vector<256x64xf32>
    %c6 = arith.constant 6 : index
    %c0_22 = arith.constant 0 : index
    %c0_23 = arith.constant 0 : index
    %41 = vector.load %arg2[%c6, %c0_22, %c0_23] : memref<9x64x64xf32, #tpu.memory_space<vmem>>, vector<1x64x64xf32>
    %42 = vector.shape_cast %41 : vector<1x64x64xf32> to vector<64x64xf32>
    %cst_24 = arith.constant dense<0.000000e+00> : vector<256x64xf32>
    %43 = tpu.matmul %40, %42, %cst_24 {dimension_numbers = #tpu.dot_dimension_numbers<[1], [0], [0], [1], [0, 0, 1, 1], [], []>} : vector<256x64xf32>, vector<64x64xf32>, vector<256x64xf32> -> vector<256x64xf32>
    %44 = arith.addf %38, %43 : vector<256x64xf32>
    %45 = vector.extract_strided_slice %1 {offsets = [2, 1, 0], sizes = [16, 16, 64], strides = [1, 1, 1]} : vector<18x18x64xf32> to vector<16x16x64xf32>
    %46 = vector.shape_cast %45 : vector<16x16x64xf32> to vector<256x64xf32>
    %c7 = arith.constant 7 : index
    %c0_25 = arith.constant 0 : index
    %c0_26 = arith.constant 0 : index
    %47 = vector.load %arg2[%c7, %c0_25, %c0_26] : memref<9x64x64xf32, #tpu.memory_space<vmem>>, vector<1x64x64xf32>
    %48 = vector.shape_cast %47 : vector<1x64x64xf32> to vector<64x64xf32>
    %cst_27 = arith.constant dense<0.000000e+00> : vector<256x64xf32>
    %49 = tpu.matmul %46, %48, %cst_27 {dimension_numbers = #tpu.dot_dimension_numbers<[1], [0], [0], [1], [0, 0, 1, 1], [], []>} : vector<256x64xf32>, vector<64x64xf32>, vector<256x64xf32> -> vector<256x64xf32>
    %50 = arith.addf %44, %49 : vector<256x64xf32>
    %51 = vector.extract_strided_slice %1 {offsets = [2, 2, 0], sizes = [16, 16, 64], strides = [1, 1, 1]} : vector<18x18x64xf32> to vector<16x16x64xf32>
    %52 = vector.shape_cast %51 : vector<16x16x64xf32> to vector<256x64xf32>
    %c8 = arith.constant 8 : index
    %c0_28 = arith.constant 0 : index
    %c0_29 = arith.constant 0 : index
    %53 = vector.load %arg2[%c8, %c0_28, %c0_29] : memref<9x64x64xf32, #tpu.memory_space<vmem>>, vector<1x64x64xf32>
    %54 = vector.shape_cast %53 : vector<1x64x64xf32> to vector<64x64xf32>
    %cst_30 = arith.constant dense<0.000000e+00> : vector<256x64xf32>
    %55 = tpu.matmul %52, %54, %cst_30 {dimension_numbers = #tpu.dot_dimension_numbers<[1], [0], [0], [1], [0, 0, 1, 1], [], []>} : vector<256x64xf32>, vector<64x64xf32>, vector<256x64xf32> -> vector<256x64xf32>
    %56 = arith.addf %50, %55 : vector<256x64xf32>
    %57 = vector.shape_cast %56 : vector<256x64xf32> to vector<1x16x16x64xf32>
    %c0_31 = arith.constant 0 : index
    %c0_32 = arith.constant 0 : index
    %c0_33 = arith.constant 0 : index
    %c0_34 = arith.constant 0 : index
    %58 = vector.load %arg3[%c0_31, %c0_32, %c0_33, %c0_34] : memref<1x16x16x64xf32, #tpu.memory_space<vmem>>, vector<1x16x16x64xf32>
    tpu.vector_store %arg3[%c0_31, %c0_32, %c0_33, %c0_34], %57 {strides = array<i32>} : memref<1x16x16x64xf32, #tpu.memory_space<vmem>>, vector<1x16x16x64xf32>,
    return
  }
  func.func @transform_0(%arg0: i32) -> (i32, i32, i32, i32) {
    %c0_i32 = arith.constant 0 : i32
    %c0_i32_0 = arith.constant 0 : i32
    %c0_i32_1 = arith.constant 0 : i32
    %c0_i32_2 = arith.constant 0 : i32
    return %arg0, %c0_i32, %c0_i32_0, %c0_i32_1 : i32, i32, i32, i32
  }
  func.func @transform_1(%arg0: i32) -> (i32, i32, i32) {
    %c0_i32 = arith.constant 0 : i32
    %c0_i32_0 = arith.constant 0 : i32
    %c0_i32_1 = arith.constant 0 : i32
    %c0_i32_2 = arith.constant 0 : i32
    return %c0_i32, %c0_i32_0, %c0_i32_1 : i32, i32, i32
  }
  func.func @transform_2(%arg0: i32) -> (i32, i32, i32, i32) {
    %c0_i32 = arith.constant 0 : i32
    %c0_i32_0 = arith.constant 0 : i32
    %c0_i32_1 = arith.constant 0 : i32
    %c0_i32_2 = arith.constant 0 : i32
    return %arg0, %c0_i32, %c0_i32_0, %c0_i32_1 : i32, i32, i32, i32
  }
}

</mosaic_0001>

<bundles_post_ra>
// kernel: tpu_custom_call.1
= control target key start
LH: loop header
LB: loop body
LE: loop exit
PB: predicated region body
PF: predicated region fallthrough
CT: control target
= control target key end

     0   :  { %7 = vsyncpa [#allocation3], 0  ;;  %s4206_s0 = inlined_call_operand.vmem [shape: f32[2,18,18,64], index: 0, kind: input, shape index: {}]   ;;  %s4207_s1 = inlined_call_operand.vmem [shape: f32[9,64,64], index: 1, kind: input, shape index: {}]   ;;  %s4208_s2 = inlined_call_operand.hbm [shape: f32[2,16,16,64], index: 2, kind: output, shape index: {}]  }
   0x1   :  { %9 = vsyncpa [#allocation3 + $0x1], 0  ;;  %s2618_s9 = smov 0   ;;  %s2620_s10 = smov 0  }
   0x2   :  { %s2622_s11 = smov 0   ;;  %s2624_s12 = smov 0  }
   0x3 LB: > { %s2639_s13 = sadd.s32 4294967295, %s2599_s12   ;;  %s2080_s14 = sadd.s32 4294967294, %s2599_s12   ;;  %s2599_s12 = sphi %s2624_s12, %s4409_s12   ;;  %s2595_s11 = sphi %s2622_s11, %s4408_s11   ;;  %s2591_s10 = sphi %s2620_s10, %s4407_s10   ;;  %s2587_s9 = sphi %s2618_s9, %s4406_s9  }
   0x4   : > { %s2643_s15 = sadd.s32 1, %s2599_s12   ;;  %s69_s16 = sadd.s32 1, %s2595_s11 }
   0x5   : > { %s66_s17 = ssub.s32 %s2599_s12, %s2643_s15  ;;  %p79_p0 = scmp.ne.s32.totalorder %s2595_s11, %s2591_s10 }
   0x6   : > { %p67_p1 = scmp.eq.s32.totalorder %s66_s17, 0  ;;  %p80_p2 = scmp.eq.s32.totalorder %s2639_s13, 1 }
   0x7   : > { %p85_p3 = scmp.ne.s32.totalorder %s2591_s10, %s2587_s9  ;;  %p86_p4 = scmp.eq.s32.totalorder %s2080_s14, 1 }
   0x8   : > { %s2654_s18 = scalar_select %p67_p1, %s2595_s11, %s69_s16  }
   0x9   : > { %p2656_p5 = por %p80_p2, %p79_p0  ;;  %p2660_p6 = por %p86_p4, %p85_p3 }
   0xa   : > { %p2083_p7 = scmp.ge.s32.totalorder %s2599_s12, 1  ;;  %p115_p8 = scmp.lt.s32.totalorder %s2599_s12, 3 }
   0xc   : > { %p116_p9 = pnand %p2083_p7, %p115_p8 }
   0xe   : > { %119 = sbr.rel (%p116_p9) target bundleno = 745 (0x2e9), region = 28 }
  0x13   : > { %v2093_v0 = vld [vmem:[%s4207_s1 + $0x78] sm:$0xff]  ;;  %v2092_v1 = vld [vmem:[%s4207_s1 + $0x70] sm:$0xff]  ;;  %p137_p10 = scmp.lt.s32.totalorder %s2639_s13, 1  ;;  %v2091_v2 = vld [vmem:[%s4207_s1 + $0x68] sm:$0xff]  ;;  %vm252_vm0 = vcmask 1046528   ;;  %vm342_vm1 = vcmask 523264  }
  0x14   : > { %2444 = vmatpush.msra.mxu1 %v2093_v0  ;;  %2445 = vmatpush.msra.mxu2 %v2093_v0  ;;  %v2090_v3 = vld [vmem:[%s4207_s1 + $0x60] sm:$0xff]  ;;  %v2089_v4 = vld [vmem:[%s4207_s1 + $0x58] sm:$0xff]  ;;  %v2088_v5 = vld [vmem:[%s4207_s1 + $0x50] sm:$0xff]  ;;  %vm697_vm2 = vcmask 1045504   ;;  %s134_s25 = sand.u32 1, %s2591_s10   ;;  %s2557_s16 = scalar_lea.hbm %s4208_s2, 512 }
  0x15   : > { %2446 = vmatpush.msra.mxu3 %v2093_v0  ;;  %415 = vmatpush.msra.mxu0 %v2093_v0  ;;  %s138_s27 = scalar_select %p137_p10, %s2639_s13, 1  ;;  %v2087_v16 = vld [vmem:[%s4207_s1 + $0x48] sm:$0xff]  ;;  %v2086_v21 = vld [vmem:[%s4207_s1 + $0x40] sm:$0xff]  ;;  %v2165_v24 = vld [vmem:[%s4207_s1 + $0xb8] sm:$0xff] }
  0x16   : > { %2447 = vmatpush.msra.mxu1 %v2092_v1  ;;  %2448 = vmatpush.msra.mxu2 %v2092_v1  ;;  %v203_v30 = vld [vmem:[%s4207_s1 + $0x38] sm:$0xff]  ;;  %v2164_v32 = vld [vmem:[%s4207_s1 + $0xb0] sm:$0xff]  ;;  %v2163_v41 = vld [vmem:[%s4207_s1 + $0xa8] sm:$0xff]  ;;  %s2084_s26 = sshll.u32 %s134_s25, 8 }
  0x17   : > { %2449 = vmatpush.msra.mxu3 %v2092_v1  ;;  %416 = vmatpush.msra.mxu0 %v2092_v1  ;;  %s2468_s30 = smul.u32 432, %s138_s27  ;;  %v2205_v31 = vld [vmem:[%s4207_s1 + $0xf8] sm:$0xff]  ;;  %v202_v36 = vld [vmem:[%s4207_s1 + $0x30] sm:$0xff]  ;;  %v2203_v43 = vld [vmem:[%s4207_s1 + $0xe8] sm:$0xff]  ;;  %s3958_s27 = scalar_lea.vmem [#allocation2], %s2084_s26 }
  0x18   : > { %2450 = vmatpush.msra.mxu1 %v2091_v2  ;;  %2451 = vmatpush.msra.mxu2 %v2091_v2  ;;  %v2204_v38 = vld [vmem:[%s4207_s1 + $0xf0] sm:$0xff]  ;;  %v2245_v40 = vld [vmem:[%s4207_s1 + $0x138] sm:$0xff]  ;;  %v201_v44 = vld [vmem:[%s4207_s1 + $0x28] sm:$0xff]  ;;  %s2015_s3 = sshll.u32 %s3958_s27, 4  ;;  %s2016_s3 = int_to_ptr.vmem [resolvable:$true] %s2015_s3 }
  0x19   : > { %2452 = vmatpush.msra.mxu3 %v2091_v2  ;;  %417 = vmatpush.msra.mxu0 %v2091_v2  ;;  %s2689_s14 = scalar_lea.vmem %s4206_s0, %s2468_s30  ;;  %v2244_v49 = vld [vmem:[%s4207_s1 + $0x130] sm:$0xff]  ;;  %v2162_v53 = vld [vmem:[%s4207_s1 + $0xa0] sm:$0xff]  ;;  %v2243_v59 = vld [vmem:[%s4207_s1 + $0x128] sm:$0xff] }
  0x1a   : > { %2453 = vmatpush.msra.mxu1 %v2090_v3  ;;  %2454 = vmatpush.msra.mxu2 %v2090_v3  ;;  %v2692_v6 = vld [vmem:[%s2689_s14 + $0x60] sm:$0xff]  ;;  %v2695_v7 = vld [vmem:[%s2689_s14 + $0x68] sm:$0xff]  ;;  %v2734_v25 = vld [vmem:[%s2689_s14 + $0x70] sm:$0x3] }
  0x1b   : > { %v2698_v8 = vld [vmem:[%s2689_s14 + $0xc0] sm:$0xff]  ;;  %2455 = vmatpush.msra.mxu3 %v2090_v3  ;;  %v2701_v9 = vld [vmem:[%s2689_s14 + $0xc8] sm:$0xff]  ;;  %418 = vmatpush.msra.mxu0 %v2090_v3  ;;  %v273_v12 = vrot.slane %v2692_v6, 1  ;;  %v274_v13 = vrot.slane %v2695_v7, 1  ;;  %v2737_v26 = vld [vmem:[%s2689_s14 + $0xd0] sm:$0x3] }
  0x1c   : > { %v178_v10 = vld [vmem:[%s2689_s14 + $0x120] sm:$0xff]  ;;  %v2705_v11 = vld [vmem:[%s2689_s14 + $0x128] sm:$0xff]  ;;  %2456 = vmatpush.msra.mxu1 %v2089_v4  ;;  %2457 = vmatpush.msra.mxu2 %v2089_v4  ;;  %v293_v14 = vrot.slane %v2698_v8, 1  ;;  %v294_v15 = vrot.slane %v2701_v9, 1  ;;  %v180_v33 = vld [vmem:[%s2689_s14 + $0x130] sm:$0x3] }
  0x1d   : > { %2458 = vmatpush.msra.mxu3 %v2089_v4  ;;  %419 = vmatpush.msra.mxu0 %v2089_v4  ;;  %v313_v17 = vrot.slane %v178_v10, 1  ;;  %v314_v18 = vrot.slane %v2705_v11, 1  ;;  %v2716_v19 = vld [vmem:[%s2689_s14] sm:$0xff]  ;;  %v2719_v20 = vld [vmem:[%s2689_s14 + $0x8] sm:$0xff]  ;;  %v2725_v22 = vsel %vm252_vm0, %v273_v12, %v274_v13  ;;  %v276_v34 = vrot.slane %v2734_v25, 1  ;;  %v2792_v47 = vld [vmem:[%s2689_s14 + $0x78] sm:$0xff] }
  0x1e   : > { %2459 = vmatpush.msra.mxu1 %v2088_v5  ;;  %2460 = vmatpush.msra.mxu2 %v2088_v5  ;;  %v2728_v23 = vsel %vm252_vm0, %v293_v14, %v294_v15  ;;  %v253_v27 = vrot.slane %v2716_v19, 1  ;;  %v254_v28 = vrot.slane %v2719_v20, 1  ;;  %v296_v35 = vrot.slane %v2737_v26, 1  ;;  %v2776_v42 = vld [vmem:[%s2689_s14 + $0x10] sm:$0x3]  ;;  %v2795_v48 = vld [vmem:[%s2689_s14 + $0x80] sm:$0xff] }
  0x1f   : > { %2461 = vmatpush.msra.mxu3 %v2088_v5  ;;  %420 = vmatpush.msra.mxu0 %v2088_v5  ;;  %4277 = vst [vmem:[#allocation5_spill] sm:$0xff] %v2728_v23  ;;  %v2742_v29 = vsel %vm252_vm0, %v313_v17, %v314_v18  ;;  %v316_v39 = vrot.slane %v180_v33, 1  ;;  %v2785_v45 = vsel %vm252_vm0, %v274_v13, %v276_v34  ;;  %v2801_v50 = vld [vmem:[%s2689_s14 + $0xd8] sm:$0xff]  ;;  %v2804_v51 = vld [vmem:[%s2689_s14 + $0xe0] sm:$0xff]  ;;  %v256_v52 = vrot.slane %v2776_v42, 1  ;;  %v2160_v13 = vld [vmem:[%s4207_s1 + $0x90] sm:$0xff] }
  0x20   : > { %2462 = vmatpush.msra.mxu1 %v2087_v16  ;;  %2463 = vmatpush.msra.mxu2 %v2087_v16  ;;  %4278 = vst [vmem:[#allocation6_spill] sm:$0xff] %v2742_v29  ;;  %v255_v37 = vsel %vm252_vm0, %v253_v27, %v254_v28  ;;  %v2788_v46 = vsel %vm252_vm0, %v294_v15, %v296_v35  ;;  %v2814_v55 = vld [vmem:[%s2689_s14 + $0x138] sm:$0xff]  ;;  %v200_v56 = vld [vmem:[%s4207_s1 + $0x20] sm:$0xff]  ;;  %v278_v60 = vrot.slane %v2792_v47, 1  ;;  %v279_v61 = vrot.slane %v2795_v48, 1  ;;  %v2200_v14 = vld [vmem:[%s4207_s1 + $0xd0] sm:$0xff] }
  0x21   : > { %2464 = vmatpush.msra.mxu3 %v2087_v16  ;;  %421 = vmatpush.msra.mxu0 %v2087_v16  ;;  %4279 = vst [vmem:[#allocation7_spill] sm:$0xff] %v2788_v46  ;;  %v2811_v54 = vsel %vm252_vm0, %v314_v18, %v316_v39  ;;  %v2824_v57 = vld [vmem:[%s2689_s14 + $0x140] sm:$0xff]  ;;  %v298_v62 = vrot.slane %v2801_v50, 1  ;;  %v299_v63 = vrot.slane %v2804_v51, 1  ;;  %v2161_v0 = vld [vmem:[%s4207_s1 + $0x98] sm:$0xff]  ;;  %v257_v2 = vsel %vm252_vm0, %v254_v28, %v256_v52  ;;  %v198_v15 = vld [vmem:[%s4207_s1 + $0x10] sm:$0xff] }
  0x22   : > { %2465 = vmatpush.msra.mxu1 %v2086_v21  ;;  %2466 = vmatpush.msra.mxu2 %v2086_v21  ;;  %4280 = vst [vmem:[#allocation8_spill] sm:$0xff] %v2811_v54  ;;  %v2202_v58 = vld [vmem:[%s4207_s1 + $0xe0] sm:$0xff]  ;;  %v199_v1 = vld [vmem:[%s4207_s1 + $0x18] sm:$0xff]  ;;  %v318_v5 = vrot.slane %v2814_v55, 1  ;;  %v319_v10 = vrot.slane %v2824_v57, 1  ;;  %v2869_v16 = vsel %vm252_vm0, %v278_v60, %v279_v61  ;;  %v2934_v52 = vld [vmem:[%s2689_s14 + $0xf0] sm:$0xff] }
  0x23   : > { %2102 = vmatmul.msk.f32.vlgmr.msra.gmra.mxu1 %vm342_vm1, %v2725_v22  ;;  %2110 = vmatmul.msk.f32.vlgmr.msra.gmra.mxu2 %vm342_vm1, %v2728_v23  ;;  %4281 = vst [vmem:[#allocation9_spill] sm:$0xff] %v2814_v55  ;;  %v2846_v3 = vld [vmem:[%s2689_s14 + $0x18] sm:$0xff]  ;;  %v2854_v11 = vld [vmem:[%s2689_s14 + $0x20] sm:$0xff]  ;;  %v2872_v17 = vsel %vm252_vm0, %v298_v62, %v299_v63  ;;  %v2876_v18 = vld [vmem:[%s2689_s14 + $0x88] sm:$0x3] }
  0x24   : > { %859 = vmatpush.msrb.mxu2 %v2165_v24  ;;  %2467 = vmatpush.msra.mxu3 %v2086_v21  ;;  %4282 = vst [vmem:[#allocation10_spill] sm:$0xff] %v2824_v57  ;;  %v2201_v4 = vld [vmem:[%s4207_s1 + $0xd8] sm:$0xff]  ;;  %v2242_v12 = vld [vmem:[%s4207_s1 + $0x120] sm:$0xff]  ;;  %v258_v24 = vrot.slane %v2846_v3, 1  ;;  %v259_v27 = vrot.slane %v2854_v11, 1  ;;  %v281_v33 = vrot.slane %v2876_v18, 1 }
  0x25   : > { %2118 = vmatmul.msk.f32.vlgmr.msra.gmra.mxu3 %vm342_vm1, %v2742_v29  ;;  %592 = vmatpush.msrb.mxu1 %v203_v30  ;;  %4283 = vst [vmem:[#allocation11_spill] sm:$0xff] %v2869_v16  ;;  %v2241_v28 = vld [vmem:[%s4207_s1 + $0x118] sm:$0xff]  ;;  %v2887_v30 = vsel %vm252_vm0, %v318_v5, %v319_v10  ;;  %v2239_v5 = vld [vmem:[%s4207_s1 + $0x108] sm:$0xff] }
  0x26   : > { %1019 = vmatpush.msrb.mxu3 %v2205_v31  ;;  %860 = vmatpush.msrb.mxu2 %v2164_v32  ;;  %4284 = vst [vmem:[#allocation12_spill] sm:$0xff] %v2887_v30  ;;  %v2894_v31 = vld [vmem:[%s2689_s14 + $0x148] sm:$0x3]  ;;  %v2904_v35 = vsel %vm252_vm0, %v258_v24, %v259_v27  ;;  %v2951_v60 = vld [vmem:[%s2689_s14 + $0x158] sm:$0xff] }
  0x27   : > { %422 = vmatpush.msra.mxu0 %v2086_v21  ;;  %593 = vmatpush.msrb.mxu1 %v202_v36  ;;  %v2879_v21 = vld [vmem:[%s2689_s14 + $0xe8] sm:$0x3]  ;;  %4285 = vst [vmem:[#allocation13_spill] sm:$0xff] %v2894_v31  ;;  %v321_v39 = vrot.slane %v2894_v31, 1 }
  0x28   : > { %2094 = vmatmul.msk.f32.vlgmr.msra.gmra.mxu0 %vm342_vm1, %v255_v37  ;;  %1020 = vmatpush.msrb.mxu3 %v2204_v38  ;;  %v2159_v32 = vld [vmem:[%s4207_s1 + $0x88] sm:$0xff]  ;;  %v301_v34 = vrot.slane %v2879_v21, 1  ;;  %v2240_v37 = vld [vmem:[%s4207_s1 + $0x110] sm:$0xff]  ;;  %4289 = vst [vmem:[#allocation17_spill] sm:$0xff] %v2951_v60 }
  0x29   : > { %1183 = vmatpush.msrb.mxu0 %v2245_v40  ;;  %861 = vmatpush.msrb.mxu2 %v2163_v41  ;;  %v2199_v36 = vld [vmem:[%s4207_s1 + $0xc8] sm:$0xff]  ;;  %v2920_v41 = vsel %vm252_vm0, %v279_v61, %v281_v33  ;;  %v2158_v61 = vld [vmem:[%s4207_s1 + $0x80] sm:$0xff] }
  0x2a   : > { %1021 = vmatpush.msrb.mxu3 %v2203_v43  ;;  %594 = vmatpush.msrb.mxu1 %v201_v44  ;;  %v197_v38 = vld [vmem:[%s4207_s1 + $0x8] sm:$0xff]  ;;  %4286 = vst [vmem:[#allocation14_spill] sm:$0xff] %v2920_v41  ;;  %v2923_v43 = vsel %vm252_vm0, %v299_v63, %v301_v34  ;;  %v2928_v44 = vld [vmem:[%s2689_s14 + $0x90] sm:$0xff] }
  0x2b   : > { %2103 = vmatmul.msk.f32.gmra.mxu1 %vm342_vm1, %v2785_v45  ;;  %2111 = vmatmul.msk.f32.gmra.mxu2 %vm342_vm1, %v2788_v46  ;;  %v2917_v40 = vld [vmem:[%s2689_s14 + $0x28] sm:$0x3]  ;;  %v283_v62 = vrot.slane %v2928_v44, 1 }
  0x2c   : > { %1184 = vmatpush.msrb.mxu0 %v2244_v49  ;;  %862 = vmatpush.msrb.mxu2 %v2162_v53  ;;  %v2931_v49 = vld [vmem:[%s2689_s14 + $0x98] sm:$0xff]  ;;  %v3080_v57 = vld [vmem:[%s2689_s14 + $0x48] sm:$0xff] }
  0x2d   : > { %2119 = vmatmul.msk.f32.gmra.mxu3 %vm342_vm1, %v2811_v54  ;;  %595 = vmatpush.msrb.mxu1 %v200_v56  ;;  %v2937_v53 = vld [vmem:[%s2689_s14 + $0xf8] sm:$0xff]  ;;  %v261_v56 = vrot.slane %v2917_v40, 1  ;;  %v284_v63 = vrot.slane %v2931_v49, 1 }
  0x2e   : > { %1022 = vmatpush.msrb.mxu3 %v2202_v58  ;;  %1185 = vmatpush.msrb.mxu0 %v2243_v59  ;;  %v2941_v58 = vsel %vm252_vm0, %v319_v10, %v321_v39  ;;  %v2948_v59 = vld [vmem:[%s2689_s14 + $0x150] sm:$0xff]  ;;  %v196_v10 = vld [vmem:[%s4207_s1] sm:$0xff] }
  0x2f   : > { %863 = vmatpush.msrb.mxu2 %v2161_v0  ;;  %596 = vmatpush.msrb.mxu1 %v199_v1  ;;  %4287 = vst [vmem:[#allocation15_spill] sm:$0xff] %v2941_v58  ;;  %v303_v0 = vrot.slane %v2934_v52, 1  ;;  %v304_v1 = vrot.slane %v2937_v53, 1  ;;  %v2983_v24 = vsel %vm252_vm0, %v283_v62, %v284_v63  ;;  %v2238_v62 = vld [vmem:[%s4207_s1 + $0x100] sm:$0xff] }
  0x30   : > { %2095 = vmatmul.msk.f32.gmra.mxu0 %vm342_vm1, %v257_v2  ;;  %1023 = vmatpush.msrb.mxu3 %v2201_v4  ;;  %4288 = vst [vmem:[#allocation16_spill] sm:$0xff] %v2948_v59  ;;  %v2963_v2 = vsel %vm252_vm0, %v259_v27, %v261_v56  ;;  %v2198_v4 = vld [vmem:[%s4207_s1 + $0xc0] sm:$0xff] }
  0x31   : > { %1186 = vmatpush.msrb.mxu0 %v2242_v12  ;;  %864 = vmatpush.msrb.mxu2 %v2160_v13  ;;  %v323_v12 = vrot.slane %v2948_v59, 1  ;;  %v324_v13 = vrot.slane %v2951_v60, 1  ;;  %4290 = vst [vmem:[#allocation18_spill] sm:$0xff] %v2983_v24  ;;  %v2986_v27 = vsel %vm252_vm0, %v303_v0, %v304_v1  ;;  %v2365_v0 = vld [vmem:[%s4207_s1 + $0x1f8] sm:$0xff]  ;;  %v3043_v60 = vld [vmem:[%s2689_s14 + $0xb0] sm:$0xff] }
  0x32   : > { %1024 = vmatpush.msrb.mxu3 %v2200_v14  ;;  %597 = vmatpush.msrb.mxu1 %v198_v15  ;;  %v2977_v14 = vld [vmem:[%s2689_s14 + $0x30] sm:$0xff]  ;;  %v2980_v15 = vld [vmem:[%s2689_s14 + $0x38] sm:$0xff] }
  0x33   : > { %2104 = vmatmul.msk.f32.gmra.mxu1 %vm342_vm1, %v2869_v16  ;;  %2112 = vmatmul.msk.f32.gmra.mxu2 %vm342_vm1, %v2872_v17  ;;  %v263_v33 = vrot.slane %v2977_v14, 1  ;;  %v264_v34 = vrot.slane %v2980_v15, 1  ;;  %v2405_v59 = vld [vmem:[%s4207_s1 + $0x238] sm:$0xff] }
  0x34   : > { %1187 = vmatpush.msrb.mxu0 %v2241_v28  ;;  %865 = vmatpush.msrb.mxu2 %v2159_v32  ;;  %v2991_v28 = vld [vmem:[%s2689_s14 + $0xa0] sm:$0x3] }
  0x35   : > { %2120 = vmatmul.msk.f32.gmra.mxu3 %vm342_vm1, %v2887_v30  ;;  %598 = vmatpush.msrb.mxu1 %v197_v38  ;;  %v2994_v32 = vld [vmem:[%s2689_s14 + $0x100] sm:$0x3]  ;;  %v2325_v38 = vld [vmem:[%s4207_s1 + $0x1b8] sm:$0xff]  ;;  %v286_v39 = vrot.slane %v2991_v28, 1  ;;  %v3083_v30 = vld [vmem:[%s2689_s14 + $0x50] sm:$0xff] }
  0x36   : > { %1025 = vmatpush.msrb.mxu3 %v2199_v36  ;;  %1188 = vmatpush.msrb.mxu0 %v2240_v37  ;;  %v2999_v36 = vsel %vm252_vm0, %v323_v12, %v324_v13  ;;  %v3006_v37 = vld [vmem:[%s2689_s14 + $0x160] sm:$0x3]  ;;  %v306_v56 = vrot.slane %v2994_v32, 1 }
  0x37   : > { %866 = vmatpush.msrb.mxu2 %v2158_v61  ;;  %599 = vmatpush.msrb.mxu1 %v196_v10  ;;  %4291 = vst [vmem:[#allocation19_spill] sm:$0xff] %v2999_v36  ;;  %v3016_v61 = vsel %vm252_vm0, %v263_v33, %v264_v34  ;;  %v3029_v10 = vld [vmem:[%s2689_s14 + $0x40] sm:$0x3]  ;;  %v3032_v12 = vsel %vm252_vm0, %v284_v63, %v286_v39  ;;  %v3063_v39 = vld [vmem:[%s2689_s14 + $0x170] sm:$0xff] }
  0x38   : > { %2096 = vmatmul.msk.f32.gmra.mxu0 %vm342_vm1, %v2904_v35  ;;  %1026 = vmatpush.msrb.mxu3 %v2198_v4  ;;  %4292 = vst [vmem:[#allocation20_spill] sm:$0xff] %v3006_v37  ;;  %v2285_v4 = vld [vmem:[%s4207_s1 + $0x178] sm:$0xff]  ;;  %v3035_v33 = vsel %vm252_vm0, %v304_v1, %v306_v56  ;;  %v3060_v1 = vld [vmem:[%s2689_s14 + $0x168] sm:$0xff] }
  0x39   : > { %1189 = vmatpush.msrb.mxu0 %v2239_v5  ;;  %1506 = vmatpush.msra.mxu2 %v2325_v38  ;;  %v326_v5 = vrot.slane %v3006_v37, 1  ;;  %4293 = vst [vmem:[#allocation21_spill] sm:$0xff] %v3032_v12  ;;  %v3040_v38 = vld [vmem:[%s2689_s14 + $0xa8] sm:$0xff]  ;;  %v328_v31 = vrot.slane %v3060_v1, 1 }
  0x3a   : > { %1670 = vmatpush.msra.mxu3 %v2365_v0  ;;  %1346 = vmatpush.msra.mxu1 %v2285_v4  ;;  %v3046_v37 = vld [vmem:[%s2689_s14 + $0x108] sm:$0xff]  ;;  %4297 = vst [vmem:[#allocation25_spill] sm:$0xff] %v3060_v1  ;;  %v288_v56 = vrot.slane %v3040_v38, 1  ;;  %v289_v0 = vrot.slane %v3043_v60, 1  ;;  %v3097_v1 = vld [vmem:[%s2689_s14 + $0x118] sm:$0x3] }
  0x3b   : > { %2105 = vmatmul.msk.f32.gmra.mxu1 %vm342_vm1, %v2920_v41  ;;  %2113 = vmatmul.msk.f32.gmra.mxu2 %vm342_vm1, %v2923_v43  ;;  %4294 = vst [vmem:[#allocation22_spill] sm:$0xff] %v3046_v37  ;;  %v3053_v63 = vsel %vm252_vm0, %v324_v13, %v326_v5  ;;  %v308_v4 = vrot.slane %v3046_v37, 1  ;;  %v311_v54 = vrot.slane %v3097_v1, 1 }
  0x3c   : > { %1190 = vmatpush.msrb.mxu0 %v2238_v62  ;;  %v266_v62 = vrot.slane %v3029_v10, 1  ;;  %4296 = vst [vmem:[#allocation24_spill] sm:$0xff] %v3053_v63  ;;  %v3086_v55 = vsel %vm252_vm0, %v288_v56, %v289_v0  ;;  %v3109_v56 = vld [vmem:[%s2689_s14 + $0x178] sm:$0x3] }
  0x3d   : > { %2121 = vmatmul.msk.f32.gmra.mxu3 %vm342_vm1, %v2941_v58  ;;  %4298 = vst [vmem:[#allocation26_spill] sm:$0xff] %v3063_v39  ;;  %v329_v58 = vrot.slane %v3063_v39, 1  ;;  %v268_v39 = vrot.slane %v3080_v57, 1 }
  0x3e   : > { %v3072_v5 = vsel %vm252_vm0, %v264_v34, %v266_v62  ;;  %1833 = vmatpush.msra.mxu0 %v2405_v59  ;;  %4299 = vst [vmem:[#allocation27_spill] sm:$0xff] %v3086_v55  ;;  %v3094_v62 = vld [vmem:[%s2689_s14 + $0xb8] sm:$0x3] }
  0x3f   : > { %4301 = vst [vmem:[#allocation29_spill] sm:$0xff] %v3097_v1  ;;  %v3102_v59 = vsel %vm252_vm0, %v328_v31, %v329_v58  ;;  %v331_v31 = vrot.slane %v3109_v56, 1 }
  0x40   : > { %2097 = vmatmul.msk.f32.gmra.mxu0 %vm342_vm1, %v2963_v2  ;;  %4302 = vst [vmem:[#allocation30_spill] sm:$0xff] %v3102_v59 }
  0x43   : > { %2106 = vmatmul.msk.f32.gmra.mxu1 %vm342_vm1, %v2983_v24  ;;  %2114 = vmatmul.msk.f32.gmra.mxu2 %vm342_vm1, %v2986_v27 }
  0x45   : > { %2122 = vmatmul.msk.f32.gmra.mxu3 %vm342_vm1, %v2999_v36  ;;  %v3049_v36 = vld [vmem:[%s2689_s14 + $0x110] sm:$0xff] }
  0x46   : > { %4295 = vst [vmem:[#allocation23_spill] sm:$0xff] %v3049_v36  ;;  %v309_v13 = vrot.slane %v3049_v36, 1  ;;  %v3120_v36 = vld [vmem:[%s2689_s14 + $0x58] sm:$0x3] }
  0x47   : > { %v271_v1 = vrot.slane %v3120_v36, 1 }
  0x48   : > { %2098 = vmatmul.msk.f32.gmra.mxu0 %vm342_vm1, %v3016_v61  ;;  %v3089_v34 = vsel %vm252_vm0, %v308_v4, %v309_v13  ;;  %v291_v4 = vrot.slane %v3094_v62, 1 }
  0x49   : > { %4300 = vst [vmem:[#allocation28_spill] sm:$0xff] %v3089_v34 }
  0x4a   : > { %v3123_v37 = vsel %vm252_vm0, %v289_v0, %v291_v4  ;;  %v699_v0 = vrot.slane %v2719_v20, 2  ;;  %v701_v4 = vrot.slane %v2776_v42, 2  ;;  %v703_v42 = vrot.slane %v2846_v3, 2 }
  0x4b   : > { %2107 = vmatmul.msk.f32.gmra.mxu1 %vm342_vm1, %v3032_v12  ;;  %2115 = vmatmul.msk.f32.gmra.mxu2 %vm342_vm1, %v3035_v33  ;;  %4303 = vst [vmem:[#allocation31_spill] sm:$0xff] %v3123_v37 }
  0x4d   : > { %2123 = vmatmul.msk.f32.gmra.mxu3 %vm342_vm1, %v3053_v63  ;;  %v269_v63 = vrot.slane %v3083_v30, 1 }
  0x4f   : > { %v3116_v29 = vsel %vm252_vm0, %v268_v39, %v269_v63  ;;  %v698_v39 = vrot.slane %v2716_v19, 2 }
  0x50   : > { %2099 = vmatmul.msk.f32.gmra.mxu0 %vm342_vm1, %v3072_v5 }
  0x53   : > { %2108 = vmatmul.msk.f32.gmra.mxu1 %vm342_vm1, %v3086_v55  ;;  %2116 = vmatmul.msk.f32.gmra.mxu2 %vm342_vm1, %v3089_v34  ;;  %v3126_v34 = vsel %vm252_vm0, %v309_v13, %v311_v54  ;;  %v3143_v54 = vsel %vm252_vm0, %v269_v63, %v271_v1  ;;  %v2324_v13 = vld [vmem:[%s4207_s1 + $0x1b0] sm:$0xff]  ;;  %v702_v1 = vsel %vm697_vm2, %v699_v0, %v701_v4 }
  0x54   : > { %1507 = vmatpush.msra.mxu2 %v2324_v13  ;;  %v2364_v63 = vld [vmem:[%s4207_s1 + $0x1f0] sm:$0xff]  ;;  %v2363_v13 = vld [vmem:[%s4207_s1 + $0x1e8] sm:$0xff] }
  0x55   : > { %2124 = vmatmul.msk.f32.gmra.mxu3 %vm342_vm1, %v3102_v59  ;;  %v3132_v59 = vsel %vm252_vm0, %v329_v58, %v331_v31  ;;  %v700_v58 = vsel %vm697_vm2, %v698_v39, %v699_v0  ;;  %v704_v31 = vrot.slane %v2854_v11, 2  ;;  %v2404_v39 = vld [vmem:[%s4207_s1 + $0x230] sm:$0xff] }
  0x56   : > { %4304 = vst [vmem:[#allocation32_spill] sm:$0xff] %v3132_v59  ;;  %1671 = vmatpush.msra.mxu3 %v2364_v63  ;;  %1834 = vmatpush.msra.mxu0 %v2404_v39  ;;  %v714_v63 = vrot.slane %v3083_v30, 2  ;;  %v719_v39 = vrot.slane %v2695_v7, 2 }
  0x57   : > { %v3177_v0 = vsel %vm697_vm2, %v703_v42, %v704_v31 }
  0x58   : > { %2100 = vmatmul.msk.f32.gmra.mxu0 %vm342_vm1, %v3116_v29  ;;  %1672 = vmatpush.msra.mxu3 %v2363_v13  ;;  %v2282_v13 = vld [vmem:[%s4207_s1 + $0x160] sm:$0xff] }
  0x5b   : > { %2109 = vmatmul.msk.f32.gmra.mxu1 %vm342_vm1, %v3123_v37  ;;  %2117 = vmatmul.msk.f32.gmra.mxu2 %vm342_vm1, %v3126_v34 }
  0x5d   : > { %2125 = vmatmul.msk.f32.gmra.mxu3 %vm342_vm1, %v3132_v59 }
  0x60   : > { %2101 = vmatmul.msk.f32.gmra.mxu0 %vm342_vm1, %v3143_v54 }
  0x63   : > { %2126 = vmatmul.msk.f32.vlgmr.msrb.gmra.mxu1 %vm342_vm1, %v2716_v19  ;;  %2166 = vmatmul.msk.f32.vlgmr.msrb.gmra.mxu2 %vm342_vm1, %v700_v58  ;;  %v2284_v19 = vld [vmem:[%s4207_s1 + $0x170] sm:$0xff]  ;;  %v711_v58 = vrot.slane %v3029_v10, 2  ;;  %v713_v10 = vrot.slane %v3080_v57, 2 }
  0x64   : > { %1347 = vmatpush.msra.mxu1 %v2284_v19  ;;  %v2403_v19 = vld [vmem:[%s4207_s1 + $0x228] sm:$0xff] }
  0x65   : > { %2206 = vmatmul.msk.f32.vlgmr.msrb.gmra.mxu3 %vm342_vm1, %v2846_v3  ;;  %1835 = vmatpush.msra.mxu0 %v2403_v19  ;;  %v724_v19 = vrot.slane %v2795_v48, 2 }
  0x68   : > { %2246 = vmatmul.msk.f32.vlgmr.msrb.gmra.mxu0 %vm342_vm1, %v2904_v35 }
  0x6b   : > { %2127 = vmatmul.msk.f32.gmra.mxu1 %vm342_vm1, %v2719_v20  ;;  %2167 = vmatmul.msk.f32.gmra.mxu2 %vm342_vm1, %v702_v1  ;;  %v706_v20 = vrot.slane %v2917_v40, 2  ;;  %v3239_v1 = vsel %vm697_vm2, %v713_v10, %v714_v63 }
  0x6d   : > { %2207 = vmatmul.msk.f32.gmra.mxu3 %vm342_vm1, %v2854_v11  ;;  %v3189_v35 = vsel %vm697_vm2, %v704_v31, %v706_v20  ;;  %v718_v31 = vrot.slane %v2692_v6, 2 }
  0x6f   : > { %v3266_v20 = vsel %vm697_vm2, %v718_v31, %v719_v39  ;;  %v2402_v31 = vld [vmem:[%s4207_s1 + $0x220] sm:$0xff] }
  0x70   : > { %2247 = vmatmul.msk.f32.gmra.mxu0 %vm342_vm1, %v2963_v2  ;;  %v709_v2 = vrot.slane %v2980_v15, 2 }
  0x71   : > { %1836 = vmatpush.msra.mxu0 %v2402_v31 }
  0x72   : > { %v3223_v4 = vsel %vm697_vm2, %v709_v2, %v711_v58  ;;  %v2362_v58 = vld [vmem:[%s4207_s1 + $0x1e0] sm:$0xff] }
  0x73   : > { %2128 = vmatmul.msk.f32.gmra.mxu1 %vm342_vm1, %v2846_v3  ;;  %2168 = vmatmul.msk.f32.gmra.mxu2 %vm342_vm1, %v3177_v0  ;;  %v708_v3 = vrot.slane %v2977_v14, 2 }
  0x74   : > { %1673 = vmatpush.msra.mxu3 %v2362_v58  ;;  %v726_v58 = vrot.slane %v2876_v18, 2  ;;  %v729_v18 = vrot.slane %v2931_v49, 2 }
  0x75   : > { %2208 = vmatmul.msk.f32.gmra.mxu3 %vm342_vm1, %v2977_v14  ;;  %v3202_v40 = vsel %vm697_vm2, %v708_v3, %v709_v2  ;;  %v2322_v3 = vld [vmem:[%s4207_s1 + $0x1a0] sm:$0xff]  ;;  %v721_v2 = vrot.slane %v2734_v25, 2 }
  0x77   : > { %v3295_v10 = vsel %vm697_vm2, %v719_v39, %v721_v2 }
  0x78   : > { %2248 = vmatmul.msk.f32.gmra.mxu0 %vm342_vm1, %v3016_v61 }
  0x7b   : > { %2129 = vmatmul.msk.f32.gmra.mxu1 %vm342_vm1, %v2854_v11  ;;  %2169 = vmatmul.msk.f32.gmra.mxu2 %vm342_vm1, %v3189_v35  ;;  %v2323_v11 = vld [vmem:[%s4207_s1 + $0x1a8] sm:$0xff] }
  0x7c   : > { %1508 = vmatpush.msra.mxu2 %v2323_v11 }
  0x7d   : > { %2209 = vmatmul.msk.f32.gmra.mxu3 %vm342_vm1, %v2980_v15 }
  0x7e   : > { %1509 = vmatpush.msra.mxu2 %v2322_v3 }
  0x80   : > { %2249 = vmatmul.msk.f32.gmra.mxu0 %vm342_vm1, %v3072_v5 }
  0x83   : > { %2130 = vmatmul.msk.f32.gmra.mxu1 %vm342_vm1, %v2977_v14  ;;  %2170 = vmatmul.msk.f32.gmra.mxu2 %vm342_vm1, %v3202_v40  ;;  %v2283_v14 = vld [vmem:[%s4207_s1 + $0x168] sm:$0xff] }
  0x84   : > { %1348 = vmatpush.msra.mxu1 %v2283_v14 }
  0x85   : > { %2210 = vmatmul.msk.f32.gmra.mxu3 %vm342_vm1, %v3080_v57 }
  0x86   : > { %1349 = vmatpush.msra.mxu1 %v2282_v13 }
  0x88   : > { %2250 = vmatmul.msk.f32.gmra.mxu0 %vm342_vm1, %v3116_v29 }
  0x8b   : > { %2131 = vmatmul.msk.f32.gmra.mxu1 %vm342_vm1, %v2980_v15  ;;  %2171 = vmatmul.msk.f32.gmra.mxu2 %vm342_vm1, %v3223_v4  ;;  %v716_v15 = vrot.slane %v3120_v36, 2 }
  0x8d   : > { %2211 = vmatmul.msk.f32.gmra.mxu3 %vm342_vm1, %v3083_v30  ;;  %v3251_v42 = vsel %vm697_vm2, %v714_v63, %v716_v15  ;;  %v723_v63 = vrot.slane %v2792_v47, 2 }
  0x8f   : > { %v3319_v2 = vsel %vm697_vm2, %v723_v63, %v724_v19 }
  0x90   : > { %2251 = vmatmul.msk.f32.gmra.mxu0 %vm342_vm1, %v3143_v54  ;;  %4307 = vst [vmem:[#allocation35_spill] sm:$0xff] %v3319_v2 }
  0x93   : > { %2132 = vmatmul.msk.f32.gmra.mxu1 %vm342_vm1, %v3080_v57  ;;  %2172 = vmatmul.msk.f32.gmra.mxu2 %vm342_vm1, %v3239_v1 }
  0x95   : > { %2212 = vmatmul.msk.f32.gmra.mxu3 %vm342_vm1, %v2692_v6 }
  0x98   : > { %2252 = vmatmul.msk.f32.gmra.mxu0 %vm342_vm1, %v2725_v22 }
  0x9b   : > { %2133 = vmatmul.msk.f32.gmra.mxu1 %vm342_vm1, %v3083_v30  ;;  %2173 = vmatmul.msk.f32.gmra.mxu2 %vm342_vm1, %v3251_v42 }
  0x9d   : > { %2213 = vmatmul.msk.f32.gmra.mxu3 %vm342_vm1, %v2695_v7 }
  0xa0   : > { %v3263_v36 = vpop.f32.mrf.mxu1  ;;  %2253 = vmatmul.msk.f32.gmra.mxu0 %vm342_vm1, %v2785_v45 }
  0xa3   : > { %2134 = vmatmul.msk.f32.gmra.mxu1 %vm342_vm1, %v2692_v6  ;;  %2174 = vmatmul.msk.f32.gmra.mxu2 %vm342_vm1, %v3266_v20 }
  0xa5   : > { %2214 = vmatmul.msk.f32.gmra.mxu3 %vm342_vm1, %v2792_v47  ;;  %v3280_v11 = vpop.f32.mrf.mxu0 }
  0xa6   : > { %v3285_v6 = vpop.f32.mrf.mxu2 }
  0xa8   : > { %v3290_v14 = vpop.f32.mrf.mxu1  ;;  %v3292_v25 = vpop.f32.mrf.mxu3  ;;  %2254 = vmatmul.msk.f32.gmra.mxu0 %vm342_vm1, %v2869_v16 }
  0xa9   : > { %4305 = vst [vmem:[#allocation33_spill] sm:$0xff] %v3292_v25  ;;  %v3339_v25 = vsel %vm697_vm2, %v724_v19, %v726_v58 }
  0xaa   : > { %4309 = vst [vmem:[#allocation37_spill] sm:$0xff] %v3339_v25 }
  0xab   : > { %2135 = vmatmul.msk.f32.gmra.mxu1 %vm342_vm1, %v2695_v7  ;;  %2175 = vmatmul.msk.f32.gmra.mxu2 %vm342_vm1, %v3295_v10 }
  0xad   : > { %2215 = vmatmul.msk.f32.gmra.mxu3 %vm342_vm1, %v2795_v48  ;;  %v3307_v15 = vpop.f32.mrf.mxu0 }
  0xae   : > { %v3312_v39 = vpop.f32.mrf.mxu2 }
  0xb0   : > { %v3314_v7 = vpop.f32.mrf.mxu1  ;;  %v3316_v3 = vpop.f32.mrf.mxu3  ;;  %2255 = vmatmul.msk.f32.gmra.mxu0 %vm342_vm1, %v2920_v41  ;;  %v731_v41 = vrot.slane %v2991_v28, 2 }
  0xb1   : > { %4306 = vst [vmem:[#allocation34_spill] sm:$0xff] %v3316_v3 }
  0xb3   : > { %2136 = vmatmul.msk.f32.gmra.mxu1 %vm342_vm1, %v2792_v47  ;;  %2176 = vmatmul.msk.f32.gmra.mxu2 %vm342_vm1, %v3319_v2  ;;  %v728_v47 = vrot.slane %v2928_v44, 2  ;;  %v734_v2 = vrot.slane %v3043_v60, 2 }
  0xb5   : > { %2216 = vmatmul.msk.f32.gmra.mxu3 %vm342_vm1, %v2928_v44  ;;  %v3330_v13 = vpop.f32.mrf.mxu0 }
  0xb6   : > { %v3332_v31 = vpop.f32.mrf.mxu2 }
  0xb8   : > { %v3334_v63 = vpop.f32.mrf.mxu1  ;;  %v3336_v3 = vpop.f32.mrf.mxu3  ;;  %2256 = vmatmul.msk.f32.gmra.mxu0 %vm342_vm1, %v2983_v24 }
  0xb9   : > { %4308 = vst [vmem:[#allocation36_spill] sm:$0xff] %v3336_v3 }
  0xbb   : > { %2137 = vmatmul.msk.f32.gmra.mxu1 %vm342_vm1, %v2795_v48  ;;  %2177 = vmatmul.msk.f32.gmra.mxu2 %vm342_vm1, %v3339_v25  ;;  %v3360_v48 = vsel %vm697_vm2, %v728_v47, %v729_v18  ;;  %v2321_v25 = vld [vmem:[%s4207_s1 + $0x198] sm:$0xff] }
  0xbc   : > { %4311 = vst [vmem:[#allocation39_spill] sm:$0xff] %v3360_v48  ;;  %1510 = vmatpush.msra.mxu2 %v2321_v25  ;;  %v3389_v25 = vsel %vm697_vm2, %v729_v18, %v731_v41  ;;  %v2401_v41 = vld [vmem:[%s4207_s1 + $0x218] sm:$0xff] }
  0xbd   : > { %2217 = vmatmul.msk.f32.gmra.mxu3 %vm342_vm1, %v2931_v49  ;;  %v3351_v3 = vpop.f32.mrf.mxu0  ;;  %4313 = vst [vmem:[#allocation41_spill] sm:$0xff] %v3389_v25  ;;  %1837 = vmatpush.msra.mxu0 %v2401_v41 }
  0xbe   : > { %v3353_v19 = vpop.f32.mrf.mxu2 }
  0xc0   : > { %v3355_v58 = vpop.f32.mrf.mxu1  ;;  %v3357_v24 = vpop.f32.mrf.mxu3  ;;  %2257 = vmatmul.msk.f32.gmra.mxu0 %vm342_vm1, %v3032_v12  ;;  %v2281_v12 = vld [vmem:[%s4207_s1 + $0x158] sm:$0xff] }
  0xc1   : > { %4310 = vst [vmem:[#allocation38_spill] sm:$0xff] %v3357_v24  ;;  %v2361_v24 = vld [vmem:[%s4207_s1 + $0x1d8] sm:$0xff]  ;;  %1350 = vmatpush.msra.mxu1 %v2281_v12 }
  0xc2   : > { %1674 = vmatpush.msra.mxu3 %v2361_v24  ;;  %v733_v24 = vrot.slane %v3040_v38, 2 }
  0xc3   : > { %2138 = vmatmul.msk.f32.gmra.mxu1 %vm342_vm1, %v2928_v44  ;;  %2178 = vmatmul.msk.f32.gmra.mxu2 %vm342_vm1, %v3360_v48 }
  0xc5   : > { %2218 = vmatmul.msk.f32.gmra.mxu3 %vm342_vm1, %v3040_v38  ;;  %v3374_v47 = vpop.f32.mrf.mxu0 }
  0xc6   : > { %v3379_v44 = vpop.f32.mrf.mxu2 }
  0xc8   : > { %v3384_v48 = vpop.f32.mrf.mxu1  ;;  %v3386_v28 = vpop.f32.mrf.mxu3  ;;  %2258 = vmatmul.msk.f32.gmra.mxu0 %vm342_vm1, %v3086_v55  ;;  %v3413_v55 = vsel %vm697_vm2, %v733_v24, %v734_v2 }
  0xc9   : > { %4312 = vst [vmem:[#allocation40_spill] sm:$0xff] %v3386_v28 }
  0xca   : > { %4315 = vst [vmem:[#allocation43_spill] sm:$0xff] %v3413_v55 }
  0xcb   : > { %2139 = vmatmul.msk.f32.gmra.mxu1 %vm342_vm1, %v2931_v49  ;;  %2179 = vmatmul.msk.f32.gmra.mxu2 %vm342_vm1, %v3389_v25  ;;  %v736_v25 = vrot.slane %v3094_v62, 2  ;;  %v739_v62 = vrot.slane %v2701_v9, 2 }
  0xcd   : > { %2219 = vmatmul.msk.f32.gmra.mxu3 %vm342_vm1, %v3043_v60  ;;  %v3401_v28 = vpop.f32.mrf.mxu0 }
  0xce   : > { %v3406_v12 = vpop.f32.mrf.mxu2 }
  0xd0   : > { %v3408_v49 = vpop.f32.mrf.mxu1  ;;  %v3410_v18 = vpop.f32.mrf.mxu3  ;;  %2259 = vmatmul.msk.f32.gmra.mxu0 %vm342_vm1, %v3123_v37  ;;  %v3433_v37 = vsel %vm697_vm2, %v734_v2, %v736_v25 }
  0xd1   : > { %4314 = vst [vmem:[#allocation42_spill] sm:$0xff] %v3410_v18 }
  0xd2   : > { %4318 = vst [vmem:[#allocation46_spill] sm:$0xff] %v3433_v37 }
  0xd3   : > { %2140 = vmatmul.msk.f32.gmra.mxu1 %vm342_vm1, %v3040_v38  ;;  %2180 = vmatmul.msk.f32.gmra.mxu2 %vm342_vm1, %v3413_v55  ;;  %v738_v38 = vrot.slane %v2698_v8, 2 }
  0xd5   : > { %2220 = vmatmul.msk.f32.gmra.mxu3 %vm342_vm1, %v2698_v8  ;;  %v3424_v41 = vpop.f32.mrf.mxu0  ;;  %v3452_v55 = vsel %vm697_vm2, %v738_v38, %v739_v62 }
  0xd6   : > { %v3426_v18 = vpop.f32.mrf.mxu2  ;;  %4321 = vst [vmem:[#allocation49_spill] sm:$0xff] %v3452_v55 }
  0xd7   : > { %4316 = vst [vmem:[#allocation44_spill] sm:$0xff] %v3426_v18 }
  0xd8   : > { %v3428_v24 = vpop.f32.mrf.mxu1  ;;  %v3430_v16 = vpop.f32.mrf.mxu3  ;;  %2260 = vmatmul.msk.f32.gmra.mxu0 %vm342_vm1, %v2728_v23 }
  0xd9   : > { %4317 = vst [vmem:[#allocation45_spill] sm:$0xff] %v3430_v16 }
  0xdb   : > { %2141 = vmatmul.msk.f32.gmra.mxu1 %vm342_vm1, %v3043_v60  ;;  %2181 = vmatmul.msk.f32.gmra.mxu2 %vm342_vm1, %v3433_v37  ;;  %v2320_v60 = vld [vmem:[%s4207_s1 + $0x190] sm:$0xff]  ;;  %v741_v37 = vrot.slane %v2737_v26, 2 }
  0xdc   : > { %1511 = vmatpush.msra.mxu2 %v2320_v60 }
  0xdd   : > { %2221 = vmatmul.msk.f32.gmra.mxu3 %vm342_vm1, %v2701_v9  ;;  %v3445_v16 = vpop.f32.mrf.mxu0  ;;  %v3474_v60 = vsel %vm697_vm2, %v739_v62, %v741_v37 }
  0xde   : > { %v3447_v2 = vpop.f32.mrf.mxu2 }
  0xdf   : > { %4319 = vst [vmem:[#allocation47_spill] sm:$0xff] %v3447_v2  ;;  %v2280_v2 = vld [vmem:[%s4207_s1 + $0x150] sm:$0xff] }
  0xe0   : > { %v3449_v25 = vpop.f32.mrf.mxu3  ;;  %v601_v23 = vpop.f32.mrf.mxu1  ;;  %2261 = vmatmul.msk.f32.gmra.mxu0 %vm342_vm1, %v2788_v46  ;;  %1351 = vmatpush.msra.mxu1 %v2280_v2 }
  0xe1   : > { %4320 = vst [vmem:[#allocation48_spill] sm:$0xff] %v3449_v25  ;;  %v602_v25 = vadd.f32 %v601_v23, %v3280_v11 }
  0xe3   : > { %2142 = vmatmul.msk.f32.gmra.mxu1 %vm342_vm1, %v2698_v8  ;;  %2182 = vmatmul.msk.f32.gmra.mxu2 %vm342_vm1, %v3452_v55  ;;  %v2360_v8 = vld [vmem:[%s4207_s1 + $0x1d0] sm:$0xff] }
  0xe4   : > { %1675 = vmatpush.msra.mxu3 %v2360_v8 }
  0xe5   : > { %2222 = vmatmul.msk.f32.gmra.mxu3 %vm342_vm1, %v2801_v50  ;;  %v1192_v38 = vpop.f32.mrf.mxu0 }
  0xe6   : > { %v868_v46 = vpop.f32.mrf.mxu2 }
  0xe7   : > { %v964_v55 = vadd.f32 %v868_v46, %v602_v25  ;;  %v743_v46 = vrot.slane %v2801_v50, 2  ;;  %v744_v25 = vrot.slane %v2804_v51, 2 }
  0xe8   : > { %v604_v18 = vpop.f32.mrf.mxu1  ;;  %v1028_v26 = vpop.f32.mrf.mxu3  ;;  %2262 = vmatmul.msk.f32.gmra.mxu0 %vm342_vm1, %v2872_v17 }
  0xe9   : > { %v1124_v23 = vadd.f32 %v1028_v26, %v964_v55  ;;  %v605_v37 = vadd.f32 %v604_v18, %v3307_v15  ;;  %v2400_v55 = vld [vmem:[%s4207_s1 + $0x210] sm:$0xff]  ;;  %v3493_v26 = vsel %vm697_vm2, %v743_v46, %v744_v25 }
  0xea   : > { %1838 = vmatpush.msra.mxu0 %v2400_v55 }
  0xeb   : > { %v3478_v11 = vadd.f32 %v1192_v38, %v1124_v23  ;;  %2143 = vmatmul.msk.f32.gmra.mxu1 %vm342_vm1, %v2701_v9  ;;  %2183 = vmatmul.msk.f32.gmra.mxu2 %vm342_vm1, %v3474_v60  ;;  %v746_v23 = vrot.slane %v2879_v21, 2  ;;  %v748_v21 = vrot.slane %v2934_v52, 2 }
  0xed   : > { %4322 = vst [vmem:[#allocation50_spill] sm:$0xff] %v3478_v11  ;;  %2223 = vmatmul.msk.f32.gmra.mxu3 %vm342_vm1, %v2804_v51  ;;  %v1195_v62 = vpop.f32.mrf.mxu0 }
  0xee   : > { %v871_v2 = vpop.f32.mrf.mxu2 }
  0xef   : > { %v965_v9 = vadd.f32 %v871_v2, %v605_v37 }
  0xf0   : > { %v607_v38 = vpop.f32.mrf.mxu1  ;;  %v1031_v8 = vpop.f32.mrf.mxu3  ;;  %2263 = vmatmul.msk.f32.gmra.mxu0 %vm342_vm1, %v2923_v43 }
  0xf1   : > { %v1125_v15 = vadd.f32 %v1031_v8, %v965_v9  ;;  %v608_v37 = vadd.f32 %v607_v38, %v3330_v13  ;;  %v749_v13 = vrot.slane %v2937_v53, 2 }
  0xf3   : > { %v3497_v18 = vadd.f32 %v1195_v62, %v1125_v15  ;;  %2144 = vmatmul.msk.f32.gmra.mxu1 %vm342_vm1, %v2801_v50  ;;  %2184 = vmatmul.msk.f32.gmra.mxu2 %vm342_vm1, %v3493_v26  ;;  %v3508_v62 = vsel %vm697_vm2, %v744_v25, %v746_v23 }
  0xf5   : > { %2224 = vmatmul.msk.f32.gmra.mxu3 %vm342_vm1, %v2934_v52  ;;  %v1198_v46 = vpop.f32.mrf.mxu0 }
  0xf6   : > { %v874_v55 = vpop.f32.mrf.mxu2 }
  0xf7   : > { %v966_v2 = vadd.f32 %v874_v55, %v608_v37  ;;  %v3524_v55 = vsel %vm697_vm2, %v748_v21, %v749_v13 }
  0xf8   : > { %v610_v11 = vpop.f32.mrf.mxu1  ;;  %v1034_v9 = vpop.f32.mrf.mxu3  ;;  %2264 = vmatmul.msk.f32.gmra.mxu0 %vm342_vm1, %v2986_v27 }
  0xf9   : > { %v1126_v50 = vadd.f32 %v1034_v9, %v966_v2  ;;  %v611_v38 = vadd.f32 %v610_v11, %v3351_v3  ;;  %v2319_v3 = vld [vmem:[%s4207_s1 + $0x188] sm:$0xff]  ;;  %v751_v11 = vrot.slane %v2994_v32, 2 }
  0xfa   : > { %1512 = vmatpush.msra.mxu2 %v2319_v3 }
  0xfb   : > { %v3512_v8 = vadd.f32 %v1198_v46, %v1126_v50  ;;  %2145 = vmatmul.msk.f32.gmra.mxu1 %vm342_vm1, %v2804_v51  ;;  %2185 = vmatmul.msk.f32.gmra.mxu2 %vm342_vm1, %v3508_v62  ;;  %v4323_v50 = vld [vmem:[#allocation22_spill] sm:$0xff] }
  0xfc   : > { %v753_v3 = vrot.slane %v4323_v50, 2 }
  0xfd   : > { %2225 = vmatmul.msk.f32.gmra.mxu3 %vm342_vm1, %v2937_v53  ;;  %v1201_v25 = vpop.f32.mrf.mxu0 }
  0xfe   : > { %v877_v15 = vpop.f32.mrf.mxu2 }
  0xff   : > { %v967_v23 = vadd.f32 %v877_v15, %v611_v38  ;;  %v2279_v15 = vld [vmem:[%s4207_s1 + $0x148] sm:$0xff] }
 0x100   : > { %v613_v37 = vpop.f32.mrf.mxu1  ;;  %v1037_v46 = vpop.f32.mrf.mxu3  ;;  %2265 = vmatmul.msk.f32.gmra.mxu0 %vm342_vm1, %v3035_v33  ;;  %1352 = vmatpush.msra.mxu1 %v2279_v15 }
 0x101   : > { %v1127_v51 = vadd.f32 %v1037_v46, %v967_v23  ;;  %v614_v9 = vadd.f32 %v613_v37, %v3374_v47  ;;  %v3548_v46 = vsel %vm697_vm2, %v749_v13, %v751_v11  ;;  %v4324_v47 = vld [vmem:[#allocation28_spill] sm:$0xff] }
 0x103   : > { %v3528_v2 = vadd.f32 %v1201_v25, %v1127_v51  ;;  %2146 = vmatmul.msk.f32.gmra.mxu1 %vm342_vm1, %v2934_v52  ;;  %2186 = vmatmul.msk.f32.gmra.mxu2 %vm342_vm1, %v3524_v55  ;;  %v2359_v52 = vld [vmem:[%s4207_s1 + $0x1c8] sm:$0xff] }
 0x104   : > { %1676 = vmatpush.msra.mxu3 %v2359_v52 }
 0x105   : > { %2226 = vmatmul.msk.f32.gmra.mxu3 %vm342_vm1, %v4323_v50  ;;  %v1204_v21 = vpop.f32.mrf.mxu0 }
 0x106   : > { %v880_v38 = vpop.f32.mrf.mxu2 }
 0x107   : > { %v968_v25 = vadd.f32 %v880_v38, %v614_v9  ;;  %v4326_v9 = vld [vmem:[#allocation23_spill] sm:$0xff] }
 0x108   : > { %v616_v23 = vpop.f32.mrf.mxu1  ;;  %v1040_v32 = vpop.f32.mrf.mxu3  ;;  %2266 = vmatmul.msk.f32.gmra.mxu0 %vm342_vm1, %v4324_v47  ;;  %v754_v52 = vrot.slane %v4326_v9, 2 }
 0x109   : > { %v1128_v37 = vadd.f32 %v1040_v32, %v968_v25  ;;  %v617_v13 = vadd.f32 %v616_v23, %v3401_v28 }
 0x10a   : > { %v3567_v32 = vsel %vm697_vm2, %v753_v3, %v754_v52 }
 0x10b   : > { %v3552_v51 = vadd.f32 %v1204_v21, %v1128_v37  ;;  %2147 = vmatmul.msk.f32.gmra.mxu1 %vm342_vm1, %v2937_v53  ;;  %2187 = vmatmul.msk.f32.gmra.mxu2 %vm342_vm1, %v3548_v46  ;;  %v2399_v21 = vld [vmem:[%s4207_s1 + $0x208] sm:$0xff]  ;;  %v4328_v37 = vld [vmem:[#allocation29_spill] sm:$0xff] }
 0x10c   : > { %1839 = vmatpush.msra.mxu0 %v2399_v21  ;;  %v756_v21 = vrot.slane %v4328_v37, 2 }
 0x10d   : > { %4325 = vst [vmem:[#allocation22_spill] sm:$0xff] %v3552_v51  ;;  %2227 = vmatmul.msk.f32.gmra.mxu3 %vm342_vm1, %v4326_v9  ;;  %v1207_v11 = vpop.f32.mrf.mxu0 }
 0x10e   : > { %v883_v38 = vpop.f32.mrf.mxu2 }
 0x10f   : > { %v969_v53 = vadd.f32 %v883_v38, %v617_v13  ;;  %v3580_v38 = vld [vmem:[%s2689_s14 + $0x120] sm:$0xff] }
 0x110   : > { %v619_v25 = vpop.f32.mrf.mxu1  ;;  %v1043_v15 = vpop.f32.mrf.mxu3  ;;  %2267 = vmatmul.msk.f32.gmra.mxu0 %vm342_vm1, %v3126_v34 }
 0x111   : > { %v1129_v28 = vadd.f32 %v1043_v15, %v969_v53  ;;  %v620_v13 = vadd.f32 %v619_v25, %v3424_v41  ;;  %v758_v41 = vrot.slane %v3580_v38, 2  ;;  %v3597_v25 = vld [vmem:[%s2689_s14 + $0x128] sm:$0xff] }
 0x113   : > { %v3571_v23 = vadd.f32 %v1207_v11, %v1129_v28  ;;  %2148 = vmatmul.msk.f32.gmra.mxu1 %vm342_vm1, %v4323_v50  ;;  %2188 = vmatmul.msk.f32.gmra.mxu2 %vm342_vm1, %v3567_v32  ;;  %v3585_v50 = vsel %vm697_vm2, %v754_v52, %v756_v21  ;;  %v759_v52 = vrot.slane %v3597_v25, 2 }
 0x115   : > { %4327 = vst [vmem:[#allocation28_spill] sm:$0xff] %v3571_v23  ;;  %2228 = vmatmul.msk.f32.gmra.mxu3 %vm342_vm1, %v3580_v38  ;;  %v1210_v3 = vpop.f32.mrf.mxu0  ;;  %v4329_v23 = vld [vmem:[#allocation6_spill] sm:$0xff] }
 0x116   : > { %v886_v53 = vpop.f32.mrf.mxu2 }
 0x117   : > { %v970_v11 = vadd.f32 %v886_v53, %v620_v13 }
 0x118   : > { %v622_v15 = vpop.f32.mrf.mxu1  ;;  %v1046_v28 = vpop.f32.mrf.mxu3  ;;  %2268 = vmatmul.msk.f32.gmra.mxu0 %vm342_vm1, %v4329_v23 }
 0x119   : > { %v1130_v37 = vadd.f32 %v1046_v28, %v970_v11  ;;  %v623_v21 = vadd.f32 %v622_v15, %v3445_v16  ;;  %v3604_v28 = vsel %vm697_vm2, %v758_v41, %v759_v52  ;;  %v2318_v16 = vld [vmem:[%s4207_s1 + $0x180] sm:$0xff]  ;;  %v2512_v15 = vld [vmem:[%s2689_s14 + $0x130] sm:$0x3] }
 0x11a   : > { %4331 = vst [vmem:[#allocation29_spill] sm:$0xff] %v3604_v28  ;;  %1513 = vmatpush.msra.mxu2 %v2318_v16 }
 0x11b   : > { %v3589_v51 = vadd.f32 %v1210_v3, %v1130_v37  ;;  %2149 = vmatmul.msk.f32.gmra.mxu1 %vm342_vm1, %v4326_v9  ;;  %2189 = vmatmul.msk.f32.gmra.mxu2 %vm342_vm1, %v3585_v50  ;;  %v4332_v37 = vld [vmem:[#allocation8_spill] sm:$0xff] }
 0x11d   : > { %4330 = vst [vmem:[#allocation23_spill] sm:$0xff] %v3589_v51  ;;  %2229 = vmatmul.msk.f32.gmra.mxu3 %vm342_vm1, %v3597_v25  ;;  %v1213_v13 = vpop.f32.mrf.mxu0 }
 0x11e   : > { %v889_v3 = vpop.f32.mrf.mxu2 }
 0x11f   : > { %v971_v53 = vadd.f32 %v889_v3, %v623_v21  ;;  %v761_v21 = vrot.slane %v2512_v15, 2  ;;  %v4334_v3 = vld [vmem:[#allocation9_spill] sm:$0xff] }
 0x120   : > { %v625_v11 = vpop.f32.mrf.mxu1  ;;  %v1049_v9 = vpop.f32.mrf.mxu3  ;;  %2269 = vmatmul.msk.f32.gmra.mxu0 %vm342_vm1, %v4332_v37 }
 0x121   : > { %v1131_v51 = vadd.f32 %v1049_v9, %v971_v53  ;;  %v626_v41 = vadd.f32 %v625_v11, %v3263_v36  ;;  %v3628_v16 = vsel %vm697_vm2, %v759_v52, %v761_v21  ;;  %v4335_v36 = vld [vmem:[#allocation12_spill] sm:$0xff]  ;;  %v2398_v21 = vld [vmem:[%s4207_s1 + $0x200] sm:$0xff] }
 0x122   : > { %1840 = vmatpush.msra.mxu0 %v2398_v21 }
 0x123   : > { %v3608_v23 = vadd.f32 %v1213_v13, %v1131_v51  ;;  %2150 = vmatmul.msk.f32.gmra.mxu1 %vm342_vm1, %v3580_v38  ;;  %2190 = vmatmul.msk.f32.gmra.mxu2 %vm342_vm1, %v3604_v28  ;;  %v2358_v13 = vld [vmem:[%s4207_s1 + $0x1c0] sm:$0xff] }
 0x124   : > { %1677 = vmatpush.msra.mxu3 %v2358_v13  ;;  %v4337_v13 = vld [vmem:[#allocation10_spill] sm:$0xff] }
 0x125   : > { %4333 = vst [vmem:[#allocation51_spill] sm:$0xff] %v3608_v23  ;;  %2230 = vmatmul.msk.f32.gmra.mxu3 %vm342_vm1, %v4334_v3  ;;  %v1216_v51 = vpop.f32.mrf.mxu0  ;;  %v2278_v23 = vld [vmem:[%s4207_s1 + $0x140] sm:$0xff] }
 0x126   : > { %v892_v53 = vpop.f32.mrf.mxu2  ;;  %1353 = vmatpush.msra.mxu1 %v2278_v23 }
 0x127   : > { %v972_v9 = vadd.f32 %v892_v53, %v626_v41  ;;  %v763_v41 = vrot.slane %v4334_v3, 2  ;;  %v764_v53 = vrot.slane %v4337_v13, 2  ;;  %v4339_v3 = vld [vmem:[#allocation15_spill] sm:$0xff] }
 0x128   : > { %v628_v37 = vpop.f32.mrf.mxu1  ;;  %v1052_v15 = vpop.f32.mrf.mxu3  ;;  %2270 = vmatmul.msk.f32.gmra.mxu0 %vm342_vm1, %v4335_v36  ;;  %v4345_v36 = vld [vmem:[#allocation19_spill] sm:$0xff] }
 0x129   : > { %v1132_v11 = vadd.f32 %v1052_v15, %v972_v9  ;;  %v629_v52 = vadd.f32 %v628_v37, %v3290_v14 }
 0x12b   : > { %v3632_v28 = vadd.f32 %v1216_v51, %v1132_v11  ;;  %2151 = vmatmul.msk.f32.gmra.mxu1 %vm342_vm1, %v3597_v25  ;;  %2191 = vmatmul.msk.f32.gmra.mxu2 %vm342_vm1, %v3628_v16 }
 0x12d   : > { %4336 = vst [vmem:[#allocation9_spill] sm:$0xff] %v3632_v28  ;;  %2231 = vmatmul.msk.f32.gmra.mxu3 %vm342_vm1, %v4337_v13  ;;  %v1219_v23 = vpop.f32.mrf.mxu0  ;;  %v3647_v28 = vsel %vm697_vm2, %v763_v41, %v764_v53  ;;  %v3654_v13 = vld [vmem:[%s2689_s14 + $0x138] sm:$0xff] }
 0x12e   : > { %v895_v51 = vpop.f32.mrf.mxu2  ;;  %4338 = vst [vmem:[#allocation10_spill] sm:$0xff] %v3647_v28 }
 0x12f   : > { %v973_v9 = vadd.f32 %v895_v51, %v629_v52  ;;  %4341 = vst [vmem:[#allocation53_spill] sm:$0xff] %v3654_v13  ;;  %v4342_v52 = vld [vmem:[#allocation13_spill] sm:$0xff]  ;;  %v4343_v51 = vld [vmem:[#allocation16_spill] sm:$0xff] }
 0x130   : > { %v631_v15 = vpop.f32.mrf.mxu1  ;;  %v1055_v11 = vpop.f32.mrf.mxu3  ;;  %2271 = vmatmul.msk.f32.gmra.mxu0 %vm342_vm1, %v4339_v3  ;;  %v766_v21 = vrot.slane %v4342_v52, 2  ;;  %v3672_v52 = vld [vmem:[%s2689_s14 + $0x140] sm:$0xff] }
 0x131   : > { %v1133_v14 = vadd.f32 %v1055_v11, %v973_v9  ;;  %v632_v41 = vadd.f32 %v631_v15, %v3314_v7  ;;  %4347 = vst [vmem:[#allocation54_spill] sm:$0xff] %v3672_v52  ;;  %v768_v7 = vrot.slane %v4343_v51, 2  ;;  %v4348_v15 = vld [vmem:[#allocation17_spill] sm:$0xff] }
 0x133   : > { %v3651_v37 = vadd.f32 %v1219_v23, %v1133_v14  ;;  %2152 = vmatmul.msk.f32.gmra.mxu1 %vm342_vm1, %v3654_v13  ;;  %2192 = vmatmul.msk.f32.gmra.mxu2 %vm342_vm1, %v3647_v28 }
 0x135   : > { %4340 = vst [vmem:[#allocation52_spill] sm:$0xff] %v3651_v37  ;;  %2232 = vmatmul.msk.f32.gmra.mxu3 %vm342_vm1, %v4343_v51  ;;  %v1222_v3 = vpop.f32.mrf.mxu0  ;;  %v3665_v37 = vsel %vm697_vm2, %v764_v53, %v766_v21 }
 0x136   : > { %v898_v9 = vpop.f32.mrf.mxu2  ;;  %4344 = vst [vmem:[#allocation13_spill] sm:$0xff] %v3665_v37 }
 0x137   : > { %v974_v23 = vadd.f32 %v898_v9, %v632_v41  ;;  %v769_v41 = vrot.slane %v4348_v15, 2 }
 0x138   : > { %v634_v11 = vpop.f32.mrf.mxu1  ;;  %v1058_v14 = vpop.f32.mrf.mxu3  ;;  %2272 = vmatmul.msk.f32.gmra.mxu0 %vm342_vm1, %v4345_v36 }
 0x139   : > { %v1134_v13 = vadd.f32 %v1058_v14, %v974_v23  ;;  %v635_v53 = vadd.f32 %v634_v11, %v3334_v63  ;;  %v3684_v14 = vsel %vm697_vm2, %v768_v7, %v769_v41  ;;  %v4351_v63 = vld [vmem:[#allocation20_spill] sm:$0xff] }
 0x13a   : > { %v771_v11 = vrot.slane %v4351_v63, 2 }
 0x13b   : > { %v3669_v28 = vadd.f32 %v1222_v3, %v1134_v13  ;;  %2153 = vmatmul.msk.f32.gmra.mxu1 %vm342_vm1, %v3672_v52  ;;  %2193 = vmatmul.msk.f32.gmra.mxu2 %vm342_vm1, %v3665_v37 }
 0x13d   : > { %4346 = vst [vmem:[#allocation16_spill] sm:$0xff] %v3669_v28  ;;  %2233 = vmatmul.msk.f32.gmra.mxu3 %vm342_vm1, %v4348_v15  ;;  %v1225_v21 = vpop.f32.mrf.mxu0  ;;  %v4349_v28 = vld [vmem:[#allocation24_spill] sm:$0xff] }
 0x13e   : > { %v901_v3 = vpop.f32.mrf.mxu2 }
 0x13f   : > { %v975_v13 = vadd.f32 %v901_v3, %v635_v53  ;;  %v4352_v3 = vld [vmem:[#allocation25_spill] sm:$0xff] }
 0x140   : > { %v637_v9 = vpop.f32.mrf.mxu1  ;;  %v1061_v23 = vpop.f32.mrf.mxu3  ;;  %2273 = vmatmul.msk.f32.gmra.mxu0 %vm342_vm1, %v4349_v28 }
 0x141   : > { %v1135_v36 = vadd.f32 %v1061_v23, %v975_v13  ;;  %v638_v53 = vadd.f32 %v637_v9, %v3355_v58  ;;  %v773_v58 = vrot.slane %v4352_v3, 2 }
 0x143   : > { %v3688_v37 = vadd.f32 %v1225_v21, %v1135_v36  ;;  %2154 = vmatmul.msk.f32.gmra.mxu1 %vm342_vm1, %v4343_v51  ;;  %2194 = vmatmul.msk.f32.gmra.mxu2 %vm342_vm1, %v3684_v14  ;;  %v3699_v21 = vsel %vm697_vm2, %v769_v41, %v771_v11  ;;  %v4353_v51 = vld [vmem:[#allocation30_spill] sm:$0xff] }
 0x145   : > { %4350 = vst [vmem:[#allocation17_spill] sm:$0xff] %v3688_v37  ;;  %2234 = vmatmul.msk.f32.gmra.mxu3 %vm342_vm1, %v4352_v3  ;;  %v1228_v7 = vpop.f32.mrf.mxu0 }
 0x146   : > { %v904_v52 = vpop.f32.mrf.mxu2 }
 0x147   : > { %v976_v28 = vadd.f32 %v904_v52, %v638_v53  ;;  %v4355_v52 = vld [vmem:[#allocation26_spill] sm:$0xff] }
 0x148   : > { %v640_v13 = vpop.f32.mrf.mxu1  ;;  %v1064_v36 = vpop.f32.mrf.mxu3  ;;  %2274 = vmatmul.msk.f32.gmra.mxu0 %vm342_vm1, %v4353_v51  ;;  %v774_v9 = vrot.slane %v4355_v52, 2 }
 0x149   : > { %v1136_v23 = vadd.f32 %v1064_v36, %v976_v28  ;;  %v641_v41 = vadd.f32 %v640_v13, %v3384_v48  ;;  %v3715_v28 = vld [vmem:[%s2689_s14 + $0x188] sm:$0xff] }
 0x14a   : > { %v1158_v37 = vrot.slane %v3715_v28, 1 }
 0x14b   : > { %v3703_v63 = vadd.f32 %v1228_v7, %v1136_v23  ;;  %2155 = vmatmul.msk.f32.gmra.mxu1 %vm342_vm1, %v4348_v15  ;;  %2195 = vmatmul.msk.f32.gmra.mxu2 %vm342_vm1, %v3699_v21  ;;  %v3718_v15 = vsel %vm697_vm2, %v773_v58, %v774_v9  ;;  %v776_v58 = vrot.slane %v3109_v56, 2 }
 0x14d   : > { %4354 = vst [vmem:[#allocation20_spill] sm:$0xff] %v3703_v63  ;;  %2235 = vmatmul.msk.f32.gmra.mxu3 %vm342_vm1, %v4355_v52  ;;  %v1231_v11 = vpop.f32.mrf.mxu0  ;;  %v3721_v63 = vld [vmem:[%s2689_s14 + $0x180] sm:$0xff] }
 0x14e   : > { %v907_v53 = vpop.f32.mrf.mxu2  ;;  %v1157_v13 = vrot.slane %v3721_v63, 1 }
 0x14f   : > { %v977_v7 = vadd.f32 %v907_v53, %v641_v41 }
 0x150   : > { %v643_v36 = vpop.f32.mrf.mxu1  ;;  %v1067_v23 = vpop.f32.mrf.mxu3  ;;  %2275 = vmatmul.msk.f32.gmra.mxu0 %vm342_vm1, %v3132_v59  ;;  %v3744_v59 = vsel %vm697_vm2, %v774_v9, %v776_v58 }
 0x151   : > { %v1137_v48 = vadd.f32 %v1067_v23, %v977_v7  ;;  %v644_v41 = vadd.f32 %v643_v36, %v3408_v49  ;;  %v3738_v7 = vsel %vm252_vm0, %v1157_v13, %v1158_v37 }
 0x153   : > { %v3727_v51 = vadd.f32 %v1231_v11, %v1137_v48  ;;  %2156 = vmatmul.msk.f32.gmra.mxu1 %vm342_vm1, %v4352_v3  ;;  %2196 = vmatmul.msk.f32.gmra.mxu2 %vm342_vm1, %v3718_v15  ;;  %v3741_v11 = vld [vmem:[%s2689_s14 + $0x190] sm:$0x3] }
 0x154   : > { %v1160_v49 = vrot.slane %v3741_v11, 1 }
 0x155   : > { %4356 = vst [vmem:[#allocation25_spill] sm:$0xff] %v3727_v51  ;;  %2236 = vmatmul.msk.f32.gmra.mxu3 %vm342_vm1, %v3721_v63  ;;  %v1234_v53 = vpop.f32.mrf.mxu0 }
 0x156   : > { %v910_v23 = vpop.f32.mrf.mxu2  ;;  %v3759_v58 = vsel %vm252_vm0, %v1158_v37, %v1160_v49 }
 0x157   : > { %v978_v48 = vadd.f32 %v910_v23, %v644_v41 }
 0x158   : > { %v646_v51 = vpop.f32.mrf.mxu1  ;;  %v1070_v3 = vpop.f32.mrf.mxu3  ;;  %2276 = vmatmul.msk.f32.gmra.mxu0 %vm342_vm1, %v3738_v7 }
 0x159   : > { %v1138_v56 = vadd.f32 %v1070_v3, %v978_v48  ;;  %v647_v13 = vadd.f32 %v646_v51, %v3428_v24  ;;  %v2515_v24 = vld [vmem:[%s2689_s14 + $0x30] sm:$0xff] }
 0x15b   : > { %v3749_v36 = vadd.f32 %v1234_v53, %v1138_v56  ;;  %2157 = vmatmul.msk.f32.gmra.mxu1 %vm342_vm1, %v4355_v52  ;;  %2197 = vmatmul.msk.f32.gmra.mxu2 %vm342_vm1, %v3744_v59 }
 0x15d   : > { %2237 = vmatmul.msk.f32.gmra.mxu3 %vm342_vm1, %v3715_v28  ;;  %v1237_v9 = vpop.f32.mrf.mxu0 }
 0x15e   : > { %v913_v41 = vpop.f32.mrf.mxu2 }
 0x15f   : > { %v979_v23 = vadd.f32 %v913_v41, %v647_v13 }
 0x160   : > { %v649_v48 = vpop.f32.mrf.mxu1  ;;  %v1073_v53 = vpop.f32.mrf.mxu3  ;;  %2277 = vmatmul.msk.f32.gmra.mxu0 %vm342_vm1, %v3759_v58 }
 0x161   : > { %v1139_v52 = vadd.f32 %v1073_v53, %v979_v23  ;;  %v650_v37 = vadd.f32 %v649_v48, %v3285_v6 }
 0x163   : > { %v3763_v3 = vadd.f32 %v1237_v9, %v1139_v52  ;;  %2286 = vmatmul.msk.f32.vlgmr.msra.gmra.mxu1 %vm342_vm1, %v3177_v0  ;;  %2326 = vmatmul.msk.f32.vlgmr.msra.gmra.mxu2 %vm342_vm1, %v2515_v24  ;;  %v2516_v0 = vld [vmem:[%s2689_s14 + $0x38] sm:$0xff] }
 0x165   : > { %2366 = vmatmul.msk.f32.vlgmr.msra.gmra.mxu3 %vm342_vm1, %v3016_v61  ;;  %v1240_v51 = vpop.f32.mrf.mxu0 }
 0x166   : > { %v916_v56 = vpop.f32.mrf.mxu2 }
 0x167   : > { %v980_v49 = vadd.f32 %v916_v56, %v650_v37 }
 0x168   : > { %v652_v13 = vpop.f32.mrf.mxu1  ;;  %v1076_v41 = vpop.f32.mrf.mxu3  ;;  %2406 = vmatmul.msk.f32.vlgmr.msra.gmra.mxu0 %vm342_vm1, %v3202_v40 }
 0x169   : > { %v1140_v9 = vadd.f32 %v1076_v41, %v980_v49  ;;  %v653_v6 = vadd.f32 %v652_v13, %v3312_v39 }
 0x16b   : > { %v3774_v23 = vadd.f32 %v1240_v51, %v1140_v9  ;;  %2287 = vmatmul.msk.f32.gmra.mxu1 %vm342_vm1, %v3189_v35  ;;  %2327 = vmatmul.msk.f32.gmra.mxu2 %vm342_vm1, %v2516_v0 }
 0x16d   : > { %2367 = vmatmul.msk.f32.gmra.mxu3 %vm342_vm1, %v3072_v5  ;;  %v1243_v61 = vpop.f32.mrf.mxu0 }
 0x16e   : > { %v919_v48 = vpop.f32.mrf.mxu2 }
 0x16f   : > { %v981_v53 = vadd.f32 %v919_v48, %v653_v6 }
 0x170   : > { %v655_v52 = vpop.f32.mrf.mxu1  ;;  %v1079_v24 = vpop.f32.mrf.mxu3  ;;  %2407 = vmatmul.msk.f32.gmra.mxu0 %vm342_vm1, %v3223_v4 }
 0x171   : > { %v1141_v37 = vadd.f32 %v1079_v24, %v981_v53  ;;  %v656_v35 = vadd.f32 %v655_v52, %v3332_v31 }
 0x173   : > { %v3785_v51 = vadd.f32 %v1243_v61, %v1141_v37  ;;  %2288 = vmatmul.msk.f32.gmra.mxu1 %vm342_vm1, %v3202_v40  ;;  %2328 = vmatmul.msk.f32.gmra.mxu2 %vm342_vm1, %v3080_v57 }
 0x175   : > { %2368 = vmatmul.msk.f32.gmra.mxu3 %vm342_vm1, %v3116_v29  ;;  %v1246_v5 = vpop.f32.mrf.mxu0 }
 0x176   : > { %v922_v39 = vpop.f32.mrf.mxu2 }
 0x177   : > { %v982_v56 = vadd.f32 %v922_v39, %v656_v35 }
 0x178   : > { %v658_v49 = vpop.f32.mrf.mxu1  ;;  %v1082_v13 = vpop.f32.mrf.mxu3  ;;  %2408 = vmatmul.msk.f32.gmra.mxu0 %vm342_vm1, %v3239_v1 }
 0x179   : > { %v1142_v41 = vadd.f32 %v1082_v13, %v982_v56  ;;  %v659_v29 = vadd.f32 %v658_v49, %v3353_v19 }
 0x17b   : > { %v3796_v9 = vadd.f32 %v1246_v5, %v1142_v41  ;;  %2289 = vmatmul.msk.f32.gmra.mxu1 %vm342_vm1, %v3223_v4  ;;  %2329 = vmatmul.msk.f32.gmra.mxu2 %vm342_vm1, %v3083_v30  ;;  %v2517_v30 = vld [vmem:[%s2689_s14 + $0x60] sm:$0xff] }
 0x17d   : > { %2369 = vmatmul.msk.f32.gmra.mxu3 %vm342_vm1, %v3143_v54  ;;  %v1249_v57 = vpop.f32.mrf.mxu0 }
 0x17e   : > { %v925_v40 = vpop.f32.mrf.mxu2 }
 0x17f   : > { %v983_v31 = vadd.f32 %v925_v40, %v659_v29  ;;  %v4358_v29 = vld [vmem:[#allocation11_spill] sm:$0xff] }
 0x180   : > { %v661_v0 = vpop.f32.mrf.mxu1  ;;  %v1085_v6 = vpop.f32.mrf.mxu3  ;;  %2409 = vmatmul.msk.f32.gmra.mxu0 %vm342_vm1, %v3251_v42 }
 0x181   : > { %v1143_v61 = vadd.f32 %v1085_v6, %v983_v31  ;;  %v662_v54 = vadd.f32 %v661_v0, %v3379_v44 }
 0x183   : > { %v3807_v48 = vadd.f32 %v1249_v57, %v1143_v61  ;;  %2290 = vmatmul.msk.f32.gmra.mxu1 %vm342_vm1, %v3239_v1  ;;  %2330 = vmatmul.msk.f32.gmra.mxu2 %vm342_vm1, %v2517_v30  ;;  %v2518_v1 = vld [vmem:[%s2689_s14 + $0x68] sm:$0xff]  ;;  %v4359_v61 = vld [vmem:[#allocation35_spill] sm:$0xff] }
 0x185   : > { %2370 = vmatmul.msk.f32.gmra.mxu3 %vm342_vm1, %v2725_v22  ;;  %v1252_v4 = vpop.f32.mrf.mxu0 }
 0x186   : > { %v928_v19 = vpop.f32.mrf.mxu2 }
 0x187   : > { %v984_v53 = vadd.f32 %v928_v19, %v662_v54 }
 0x188   : > { %v664_v52 = vpop.f32.mrf.mxu1  ;;  %v1088_v24 = vpop.f32.mrf.mxu3  ;;  %2410 = vmatmul.msk.f32.gmra.mxu0 %vm342_vm1, %v3266_v20 }
 0x189   : > { %v1144_v37 = vadd.f32 %v1088_v24, %v984_v53  ;;  %v665_v22 = vadd.f32 %v664_v52, %v3406_v12  ;;  %v4357_v12 = vld [vmem:[#allocation44_spill] sm:$0xff]  ;;  %v4361_v53 = vld [vmem:[#allocation14_spill] sm:$0xff] }
 0x18b   : > { %v3818_v35 = vadd.f32 %v1252_v4, %v1144_v37  ;;  %2291 = vmatmul.msk.f32.gmra.mxu1 %vm342_vm1, %v3251_v42  ;;  %2331 = vmatmul.msk.f32.gmra.mxu2 %vm342_vm1, %v2518_v1  ;;  %v2519_v42 = vld [vmem:[%s2689_s14 + $0x78] sm:$0xff]  ;;  %v4360_v4 = vld [vmem:[#allocation47_spill] sm:$0xff] }
 0x18d   : > { %2371 = vmatmul.msk.f32.gmra.mxu3 %vm342_vm1, %v2785_v45  ;;  %v1255_v44 = vpop.f32.mrf.mxu0 }
 0x18e   : > { %v931_v5 = vpop.f32.mrf.mxu2 }
 0x18f   : > { %v985_v39 = vadd.f32 %v931_v5, %v665_v22 }
 0x190   : > { %v667_v56 = vpop.f32.mrf.mxu1  ;;  %v1091_v49 = vpop.f32.mrf.mxu3  ;;  %2411 = vmatmul.msk.f32.gmra.mxu0 %vm342_vm1, %v3295_v10 }
 0x191   : > { %v1145_v13 = vadd.f32 %v1091_v49, %v985_v39  ;;  %v668_v45 = vadd.f32 %v667_v56, %v4357_v12  ;;  %v4363_v56 = vld [vmem:[#allocation33_spill] sm:$0xff] }
 0x193   : > { %v3829_v41 = vadd.f32 %v1255_v44, %v1145_v13  ;;  %2292 = vmatmul.msk.f32.gmra.mxu1 %vm342_vm1, %v3266_v20  ;;  %2332 = vmatmul.msk.f32.gmra.mxu2 %vm342_vm1, %v2519_v42  ;;  %v2520_v20 = vld [vmem:[%s2689_s14 + $0x80] sm:$0xff]  ;;  %v4364_v13 = vld [vmem:[#allocation18_spill] sm:$0xff] }
 0x194   : > { %v4362_v44 = vld [vmem:[#allocation37_spill] sm:$0xff] }
 0x195   : > { %2372 = vmatmul.msk.f32.gmra.mxu3 %vm342_vm1, %v4358_v29  ;;  %v1258_v57 = vpop.f32.mrf.mxu0 }
 0x196   : > { %v934_v40 = vpop.f32.mrf.mxu2 }
 0x197   : > { %v986_v31 = vadd.f32 %v934_v40, %v668_v45  ;;  %v4365_v40 = vld [vmem:[#allocation39_spill] sm:$0xff] }
 0x198   : > { %v670_v0 = vpop.f32.mrf.mxu1  ;;  %v1094_v6 = vpop.f32.mrf.mxu3  ;;  %2412 = vmatmul.msk.f32.gmra.mxu0 %vm342_vm1, %v4359_v61 }
 0x199   : > { %v1146_v30 = vadd.f32 %v1094_v6, %v986_v31  ;;  %v671_v19 = vadd.f32 %v670_v0, %v4360_v4  ;;  %v2522_v6 = vld [vmem:[%s2689_s14 + $0x98] sm:$0xff] }
 0x19b   : > { %v3840_v54 = vadd.f32 %v1258_v57, %v1146_v30  ;;  %2293 = vmatmul.msk.f32.gmra.mxu1 %vm342_vm1, %v3295_v10  ;;  %2333 = vmatmul.msk.f32.gmra.mxu2 %vm342_vm1, %v2520_v20  ;;  %v2521_v10 = vld [vmem:[%s2689_s14 + $0x90] sm:$0xff]  ;;  %v4367_v20 = vld [vmem:[#allocation21_spill] sm:$0xff] }
 0x19d   : > { %2373 = vmatmul.msk.f32.gmra.mxu3 %vm342_vm1, %v4361_v53  ;;  %v1261_v52 = vpop.f32.mrf.mxu0 }
 0x19e   : > { %v937_v24 = vpop.f32.mrf.mxu2 }
 0x19f   : > { %v987_v37 = vadd.f32 %v937_v24, %v671_v19 }
 0x1a0   : > { %v673_v1 = vpop.f32.mrf.mxu1  ;;  %v1097_v22 = vpop.f32.mrf.mxu3  ;;  %2413 = vmatmul.msk.f32.gmra.mxu0 %vm342_vm1, %v4362_v44 }
 0x1a1   : > { %v1147_v5 = vadd.f32 %v1097_v22, %v987_v37  ;;  %v674_v49 = vadd.f32 %v673_v1, %v4363_v56  ;;  %v4368_v37 = vld [vmem:[#allocation41_spill] sm:$0xff]  ;;  %v4370_v56 = vld [vmem:[#allocation27_spill] sm:$0xff] }
 0x1a3   : > { %v3851_v39 = vadd.f32 %v1261_v52, %v1147_v5  ;;  %2294 = vmatmul.msk.f32.gmra.mxu1 %vm342_vm1, %v4359_v61  ;;  %2334 = vmatmul.msk.f32.gmra.mxu2 %vm342_vm1, %v2521_v10  ;;  %v4366_v61 = vld [vmem:[#allocation34_spill] sm:$0xff]  ;;  %v4369_v5 = vld [vmem:[#allocation36_spill] sm:$0xff] }
 0x1a5   : > { %2374 = vmatmul.msk.f32.gmra.mxu3 %vm342_vm1, %v4364_v13  ;;  %v1264_v42 = vpop.f32.mrf.mxu0 }
 0x1a6   : > { %v940_v12 = vpop.f32.mrf.mxu2 }
 0x1a7   : > { %v988_v45 = vadd.f32 %v940_v12, %v674_v49 }
 0x1a8   : > { %v676_v29 = vpop.f32.mrf.mxu1  ;;  %v1100_v57 = vpop.f32.mrf.mxu3  ;;  %2414 = vmatmul.msk.f32.gmra.mxu0 %vm342_vm1, %v4365_v40 }
 0x1a9   : > { %v1148_v31 = vadd.f32 %v1100_v57, %v988_v45  ;;  %v677_v30 = vadd.f32 %v676_v29, %v4366_v61  ;;  %v4371_v29 = vld [vmem:[#allocation43_spill] sm:$0xff] }
 0x1ab   : > { %v3862_v0 = vadd.f32 %v1264_v42, %v1148_v31  ;;  %2295 = vmatmul.msk.f32.gmra.mxu1 %vm342_vm1, %v4362_v44  ;;  %2335 = vmatmul.msk.f32.gmra.mxu2 %vm342_vm1, %v2522_v6  ;;  %v2523_v44 = vld [vmem:[%s2689_s14 + $0xa8] sm:$0xff] }
 0x1ac   : > { %v4372_v6 = vld [vmem:[#allocation38_spill] sm:$0xff] }
 0x1ad   : > { %2375 = vmatmul.msk.f32.gmra.mxu3 %vm342_vm1, %v4367_v20  ;;  %v1267_v4 = vpop.f32.mrf.mxu0 }
 0x1ae   : > { %v943_v19 = vpop.f32.mrf.mxu2 }
 0x1af   : > { %v989_v53 = vadd.f32 %v943_v19, %v677_v30  ;;  %v4373_v30 = vld [vmem:[#allocation31_spill] sm:$0xff] }
 0x1b0   : > { %v679_v52 = vpop.f32.mrf.mxu1  ;;  %v1103_v24 = vpop.f32.mrf.mxu3  ;;  %2415 = vmatmul.msk.f32.gmra.mxu0 %vm342_vm1, %v4368_v37 }
 0x1b1   : > { %v1149_v1 = vadd.f32 %v1103_v24, %v989_v53  ;;  %v680_v10 = vadd.f32 %v679_v52, %v4369_v5  ;;  %v4374_v24 = vld [vmem:[#allocation46_spill] sm:$0xff]  ;;  %v4375_v5 = vld [vmem:[#allocation40_spill] sm:$0xff] }
 0x1b3   : > { %v3873_v22 = vadd.f32 %v1267_v4, %v1149_v1  ;;  %2296 = vmatmul.msk.f32.gmra.mxu1 %vm342_vm1, %v4365_v40  ;;  %2336 = vmatmul.msk.f32.gmra.mxu2 %vm342_vm1, %v2523_v44  ;;  %v2524_v40 = vld [vmem:[%s2689_s14 + $0xb0] sm:$0xff] }
 0x1b5   : > { %2376 = vmatmul.msk.f32.gmra.mxu3 %vm342_vm1, %v4370_v56  ;;  %v1270_v49 = vpop.f32.mrf.mxu0  ;;  %v4376_v56 = vld [vmem:[#allocation5_spill] sm:$0xff] }
 0x1b6   : > { %v946_v13 = vpop.f32.mrf.mxu2 }
 0x1b7   : > { %v990_v42 = vadd.f32 %v946_v13, %v680_v10 }
 0x1b8   : > { %v682_v12 = vpop.f32.mrf.mxu1  ;;  %v1106_v45 = vpop.f32.mrf.mxu3  ;;  %2416 = vmatmul.msk.f32.gmra.mxu0 %vm342_vm1, %v4371_v29 }
 0x1b9   : > { %v1150_v57 = vadd.f32 %v1106_v45, %v990_v42  ;;  %v683_v61 = vadd.f32 %v682_v12, %v4372_v6 }
 0x1bb   : > { %v3884_v31 = vadd.f32 %v1270_v49, %v1150_v57  ;;  %2297 = vmatmul.msk.f32.gmra.mxu1 %vm342_vm1, %v4368_v37  ;;  %2337 = vmatmul.msk.f32.gmra.mxu2 %vm342_vm1, %v2524_v40  ;;  %v2525_v37 = vld [vmem:[%s2689_s14 + $0xc0] sm:$0xff] }
 0x1bc   : > { %v4377_v57 = vld [vmem:[#allocation49_spill] sm:$0xff] }
 0x1bd   : > { %2377 = vmatmul.msk.f32.gmra.mxu3 %vm342_vm1, %v4373_v30  ;;  %v1273_v20 = vpop.f32.mrf.mxu0 }
 0x1be   : > { %v949_v4 = vpop.f32.mrf.mxu2 }
 0x1bf   : > { %v991_v19 = vadd.f32 %v949_v4, %v683_v61  ;;  %v4378_v61 = vld [vmem:[#allocation42_spill] sm:$0xff] }
 0x1c0   : > { %v685_v53 = vpop.f32.mrf.mxu1  ;;  %v1109_v52 = vpop.f32.mrf.mxu3  ;;  %2417 = vmatmul.msk.f32.gmra.mxu0 %vm342_vm1, %v4374_v24 }
 0x1c1   : > { %v1151_v1 = vadd.f32 %v1109_v52, %v991_v19  ;;  %v686_v10 = vadd.f32 %v685_v53, %v4375_v5 }
 0x1c3   : > { %v3895_v44 = vadd.f32 %v1273_v20, %v1151_v1  ;;  %2298 = vmatmul.msk.f32.gmra.mxu1 %vm342_vm1, %v4371_v29  ;;  %2338 = vmatmul.msk.f32.gmra.mxu2 %vm342_vm1, %v2525_v37  ;;  %v2526_v29 = vld [vmem:[%s2689_s14 + $0xc8] sm:$0xff]  ;;  %v4379_v20 = vld [vmem:[#allocation7_spill] sm:$0xff] }
 0x1c5   : > { %2378 = vmatmul.msk.f32.gmra.mxu3 %vm342_vm1, %v4376_v56  ;;  %v1276_v49 = vpop.f32.mrf.mxu0 }
 0x1c6   : > { %v952_v13 = vpop.f32.mrf.mxu2 }
 0x1c7   : > { %v992_v42 = vadd.f32 %v952_v13, %v686_v10  ;;  %v4380_v10 = vld [vmem:[#allocation45_spill] sm:$0xff] }
 0x1c8   : > { %v688_v12 = vpop.f32.mrf.mxu1  ;;  %v1112_v45 = vpop.f32.mrf.mxu3  ;;  %2418 = vmatmul.msk.f32.gmra.mxu0 %vm342_vm1, %v4377_v57 }
 0x1c9   : > { %v1152_v40 = vadd.f32 %v1112_v45, %v992_v42  ;;  %v689_v30 = vadd.f32 %v688_v12, %v4378_v61 }
 0x1cb   : > { %v3906_v6 = vadd.f32 %v1276_v49, %v1152_v40  ;;  %2299 = vmatmul.msk.f32.gmra.mxu1 %vm342_vm1, %v4374_v24  ;;  %2339 = vmatmul.msk.f32.gmra.mxu2 %vm342_vm1, %v2526_v29  ;;  %v2527_v24 = vld [vmem:[%s2689_s14 + $0xd8] sm:$0xff] }
 0x1cd   : > { %2379 = vmatmul.msk.f32.gmra.mxu3 %vm342_vm1, %v4379_v20  ;;  %v1279_v4 = vpop.f32.mrf.mxu0 }
 0x1ce   : > { %v955_v19 = vpop.f32.mrf.mxu2 }
 0x1cf   : > { %v993_v53 = vadd.f32 %v955_v19, %v689_v30 }
 0x1d0   : > { %v691_v52 = vpop.f32.mrf.mxu1  ;;  %v1115_v1 = vpop.f32.mrf.mxu3  ;;  %2419 = vmatmul.msk.f32.gmra.mxu0 %vm342_vm1, %v3474_v60 }
 0x1d1   : > { %v1153_v37 = vadd.f32 %v1115_v1, %v993_v53  ;;  %v692_v56 = vadd.f32 %v691_v52, %v4380_v10  ;;  %v2529_v1 = vld [vmem:[%s2689_s14 + $0xf0] sm:$0xff] }
 0x1d3   : > { %v3917_v5 = vadd.f32 %v1279_v4, %v1153_v37  ;;  %2300 = vmatmul.msk.f32.gmra.mxu1 %vm342_vm1, %v4377_v57  ;;  %2340 = vmatmul.msk.f32.gmra.mxu2 %vm342_vm1, %v2527_v24  ;;  %v2528_v57 = vld [vmem:[%s2689_s14 + $0xe0] sm:$0xff] }
 0x1d5   : > { %2380 = vmatmul.msk.f32.gmra.mxu3 %vm342_vm1, %v2872_v17  ;;  %v1282_v49 = vpop.f32.mrf.mxu0  ;;  %v4381_v17 = vld [vmem:[#allocation48_spill] sm:$0xff] }
 0x1d6   : > { %v958_v13 = vpop.f32.mrf.mxu2 }
 0x1d7   : > { %v994_v42 = vadd.f32 %v958_v13, %v692_v56 }
 0x1d8   : > { %v694_v12 = vpop.f32.mrf.mxu1  ;;  %v1118_v45 = vpop.f32.mrf.mxu3  ;;  %2420 = vmatmul.msk.f32.gmra.mxu0 %vm342_vm1, %v3493_v26 }
 0x1d9   : > { %v1154_v40 = vadd.f32 %v1118_v45, %v994_v42  ;;  %v695_v61 = vadd.f32 %v694_v12, %v4381_v17  ;;  %v2530_v12 = vld [vmem:[%s2689_s14 + $0xf8] sm:$0xff] }
 0x1db   : > { %v3928_v29 = vadd.f32 %v1282_v49, %v1154_v40  ;;  %2301 = vmatmul.msk.f32.gmra.mxu1 %vm342_vm1, %v3474_v60  ;;  %2341 = vmatmul.msk.f32.gmra.mxu2 %vm342_vm1, %v2528_v57 }
 0x1dd   : > { %2381 = vmatmul.msk.f32.gmra.mxu3 %vm342_vm1, %v2923_v43  ;;  %v1285_v30 = vpop.f32.mrf.mxu0  ;;  %v4382_v43 = vld [vmem:[#allocation50_spill] sm:$0xff] }
 0x1de   : > { %v961_v20 = vpop.f32.mrf.mxu2 }
 0x1df   : > { %v995_v4 = vadd.f32 %v961_v20, %v695_v61 }
 0x1e0   : > { %v1121_v19 = vpop.f32.mrf.mxu3  ;;  %v1355_v53 = vpop.f32.mrf.mxu1  ;;  %2421 = vmatmul.msk.f32.gmra.mxu0 %vm342_vm1, %v3508_v62 }
 0x1e1   : > { %v1155_v52 = vadd.f32 %v1121_v19, %v995_v4  ;;  %v1451_v37 = vadd.f32 %v1355_v53, %v4382_v43  ;;  %v2532_v43 = vld [vmem:[%s2689_s14 + $0x110] sm:$0xff] }
 0x1e3   : > { %v3939_v60 = vadd.f32 %v1285_v30, %v1155_v52  ;;  %2302 = vmatmul.msk.f32.gmra.mxu1 %vm342_vm1, %v3493_v26  ;;  %2342 = vmatmul.msk.f32.gmra.mxu2 %vm342_vm1, %v2529_v1 }
 0x1e5   : > { %2382 = vmatmul.msk.f32.gmra.mxu3 %vm342_vm1, %v2986_v27  ;;  %v1842_v24 = vpop.f32.mrf.mxu0 }
 0x1e6   : > { %v1515_v10 = vpop.f32.mrf.mxu2 }
 0x1e7   : > { %v1611_v56 = vadd.f32 %v1515_v10, %v1451_v37 }
 0x1e8   : > { %v1358_v49 = vpop.f32.mrf.mxu1  ;;  %v1679_v13 = vpop.f32.mrf.mxu3  ;;  %2422 = vmatmul.msk.f32.gmra.mxu0 %vm342_vm1, %v3524_v55 }
 0x1e9   : > { %v1775_v26 = vadd.f32 %v1679_v13, %v1611_v56  ;;  %v1452_v27 = vadd.f32 %v1358_v49, %v3497_v18  ;;  %v2531_v18 = vld [vmem:[%s2689_s14 + $0x108] sm:$0xff] }
 0x1eb   : > { %v1938_v42 = vadd.f32 %v1842_v24, %v1775_v26  ;;  %2303 = vmatmul.msk.f32.gmra.mxu1 %vm342_vm1, %v3508_v62  ;;  %2343 = vmatmul.msk.f32.gmra.mxu2 %vm342_vm1, %v2530_v12 }
 0x1ed   : > { %1970 = vst.msk [vmem:[%s3958_s27] sm:$0xff] %vm342_vm1, %v1938_v42  ;;  %2383 = vmatmul.msk.f32.gmra.mxu3 %vm342_vm1, %v3035_v33  ;;  %v1845_v45 = vpop.f32.mrf.mxu0 }
 0x1ee   : > { %v1518_v40 = vpop.f32.mrf.mxu2 }
 0x1ef   : > { %v1612_v57 = vadd.f32 %v1518_v40, %v1452_v27  ;;  %v4385_v40 = vld [vmem:[#allocation29_spill] sm:$0xff] }
 0x1f0   : > { %v1361_v17 = vpop.f32.mrf.mxu1  ;;  %v1682_v62 = vpop.f32.mrf.mxu3  ;;  %2423 = vmatmul.msk.f32.gmra.mxu0 %vm342_vm1, %v3548_v46 }
 0x1f1   : > { %v1776_v61 = vadd.f32 %v1682_v62, %v1612_v57  ;;  %v1453_v33 = vadd.f32 %v1361_v17, %v3512_v8  ;;  %v4387_v62 = vld [vmem:[#allocation8_spill] sm:$0xff] }
 0x1f3   : > { %v1939_v30 = vadd.f32 %v1845_v45, %v1776_v61  ;;  %2304 = vmatmul.msk.f32.gmra.mxu1 %vm342_vm1, %v3524_v55  ;;  %2344 = vmatmul.msk.f32.gmra.mxu2 %vm342_vm1, %v2531_v18 }
 0x1f5   : > { %1971 = vst.msk [vmem:[%s3958_s27 + $0x8] sm:$0xff] %vm342_vm1, %v1939_v30  ;;  %2384 = vmatmul.msk.f32.gmra.mxu3 %vm342_vm1, %v4324_v47  ;;  %v1848_v20 = vpop.f32.mrf.mxu0 }
 0x1f6   : > { %v1521_v4 = vpop.f32.mrf.mxu2 }
 0x1f7   : > { %v1613_v19 = vadd.f32 %v1521_v4, %v1453_v33 }
 0x1f8   : > { %v1364_v53 = vpop.f32.mrf.mxu1  ;;  %v1685_v52 = vpop.f32.mrf.mxu3  ;;  %2424 = vmatmul.msk.f32.gmra.mxu0 %vm342_vm1, %v3567_v32 }
 0x1f9   : > { %v1777_v55 = vadd.f32 %v1685_v52, %v1613_v19  ;;  %v1454_v8 = vadd.f32 %v1364_v53, %v3528_v2  ;;  %v4383_v2 = vld [vmem:[#allocation22_spill] sm:$0xff]  ;;  %v4389_v19 = vld [vmem:[#allocation23_spill] sm:$0xff]  ;;  %v4390_v52 = vld [vmem:[#allocation12_spill] sm:$0xff] }
 0x1fb   : > { %v1940_v1 = vadd.f32 %v1848_v20, %v1777_v55  ;;  %2305 = vmatmul.msk.f32.gmra.mxu1 %vm342_vm1, %v3548_v46  ;;  %2345 = vmatmul.msk.f32.gmra.mxu2 %vm342_vm1, %v2532_v43 }
 0x1fd   : > { %1972 = vst.msk [vmem:[%s3958_s27 + $0x10] sm:$0xff] %vm342_vm1, %v1940_v1  ;;  %2385 = vmatmul.msk.f32.gmra.mxu3 %vm342_vm1, %v3126_v34  ;;  %v1851_v47 = vpop.f32.mrf.mxu0  ;;  %v4384_v34 = vld [vmem:[#allocation6_spill] sm:$0xff] }
 0x1fe   : > { %v1524_v37 = vpop.f32.mrf.mxu2 }
 0x1ff   : > { %v1614_v24 = vadd.f32 %v1524_v37, %v1454_v8  ;;  %v4391_v37 = vld [vmem:[#allocation10_spill] sm:$0xff] }
 0x200   : > { %v1367_v10 = vpop.f32.mrf.mxu1  ;;  %v1688_v56 = vpop.f32.mrf.mxu3  ;;  %2425 = vmatmul.msk.f32.gmra.mxu0 %vm342_vm1, %v3585_v50 }
 0x201   : > { %v1778_v46 = vadd.f32 %v1688_v56, %v1614_v24  ;;  %v1455_v13 = vadd.f32 %v1367_v10, %v4383_v2  ;;  %v4392_v56 = vld [vmem:[#allocation54_spill] sm:$0xff]  ;;  %v4394_v2 = vld [vmem:[#allocation15_spill] sm:$0xff] }
 0x203   : > { %v1941_v49 = vadd.f32 %v1851_v47, %v1778_v46  ;;  %2306 = vmatmul.msk.f32.gmra.mxu1 %vm342_vm1, %v3567_v32  ;;  %2346 = vmatmul.msk.f32.gmra.mxu2 %vm342_vm1, %v3580_v38  ;;  %v4386_v38 = vld [vmem:[#allocation28_spill] sm:$0xff]  ;;  %v4393_v46 = vld [vmem:[#allocation51_spill] sm:$0xff] }
 0x205   : > { %1973 = vst.msk [vmem:[%s3958_s27 + $0x18] sm:$0xff] %vm342_vm1, %v1941_v49  ;;  %2386 = vmatmul.msk.f32.gmra.mxu3 %vm342_vm1, %v4384_v34  ;;  %v1854_v26 = vpop.f32.mrf.mxu0 }
 0x206   : > { %v1527_v42 = vpop.f32.mrf.mxu2 }
 0x207   : > { %v1615_v12 = vadd.f32 %v1527_v42, %v1455_v13 }
 0x208   : > { %v1370_v27 = vpop.f32.mrf.mxu1  ;;  %v1691_v45 = vpop.f32.mrf.mxu3  ;;  %2426 = vmatmul.msk.f32.gmra.mxu0 %vm342_vm1, %v4385_v40 }
 0x209   : > { %v1779_v32 = vadd.f32 %v1691_v45, %v1615_v12  ;;  %v1456_v17 = vadd.f32 %v1370_v27, %v4386_v38  ;;  %v4395_v27 = vld [vmem:[#allocation13_spill] sm:$0xff]  ;;  %v4397_v38 = vld [vmem:[#allocation19_spill] sm:$0xff] }
 0x20b   : > { %v1942_v57 = vadd.f32 %v1854_v26, %v1779_v32  ;;  %2307 = vmatmul.msk.f32.gmra.mxu1 %vm342_vm1, %v3585_v50  ;;  %2347 = vmatmul.msk.f32.gmra.mxu2 %vm342_vm1, %v3597_v25  ;;  %v4388_v25 = vld [vmem:[#allocation53_spill] sm:$0xff] }
 0x20c   : > { %v4396_v32 = vld [vmem:[#allocation9_spill] sm:$0xff] }
 0x20d   : > { %1974 = vst.msk [vmem:[%s3958_s27 + $0x20] sm:$0xff] %vm342_vm1, %v1942_v57  ;;  %2387 = vmatmul.msk.f32.gmra.mxu3 %vm342_vm1, %v4387_v62  ;;  %v1857_v61 = vpop.f32.mrf.mxu0 }
 0x20e   : > { %v1530_v30 = vpop.f32.mrf.mxu2 }
 0x20f   : > { %v1616_v18 = vadd.f32 %v1530_v30, %v1456_v17 }
 0x210   : > { %v1373_v33 = vpop.f32.mrf.mxu1  ;;  %v1694_v20 = vpop.f32.mrf.mxu3  ;;  %2427 = vmatmul.msk.f32.gmra.mxu0 %vm342_vm1, %v3628_v16 }
 0x211   : > { %v1780_v50 = vadd.f32 %v1694_v20, %v1616_v18  ;;  %v1457_v53 = vadd.f32 %v1373_v33, %v4389_v19  ;;  %v4399_v19 = vld [vmem:[#allocation24_spill] sm:$0xff] }
 0x213   : > { %v1943_v4 = vadd.f32 %v1857_v61, %v1780_v50  ;;  %2308 = vmatmul.msk.f32.gmra.mxu1 %vm342_vm1, %v4385_v40  ;;  %2348 = vmatmul.msk.f32.gmra.mxu2 %vm342_vm1, %v4388_v25  ;;  %v2533_v40 = vld [vmem:[%s2689_s14 + $0x150] sm:$0xff]  ;;  %v2534_v50 = vld [vmem:[%s2689_s14 + $0x158] sm:$0xff] }
 0x215   : > { %1975 = vst.msk [vmem:[%s3958_s27 + $0x28] sm:$0xff] %vm342_vm1, %v1943_v4  ;;  %2388 = vmatmul.msk.f32.gmra.mxu3 %vm342_vm1, %v4390_v52  ;;  %v1860_v55 = vpop.f32.mrf.mxu0  ;;  %v4398_v4 = vld [vmem:[#allocation52_spill] sm:$0xff] }
 0x216   : > { %v1533_v1 = vpop.f32.mrf.mxu2 }
 0x217   : > { %v1617_v43 = vadd.f32 %v1533_v1, %v1457_v53 }
 0x218   : > { %v1376_v8 = vpop.f32.mrf.mxu1  ;;  %v1697_v47 = vpop.f32.mrf.mxu3  ;;  %2428 = vmatmul.msk.f32.gmra.mxu0 %vm342_vm1, %v4391_v37 }
 0x219   : > { %v1781_v24 = vadd.f32 %v1697_v47, %v1617_v43  ;;  %v1458_v49 = vadd.f32 %v1376_v8, %v4393_v46 }
 0x21b   : > { %v1944_v10 = vadd.f32 %v1860_v55, %v1781_v24  ;;  %2309 = vmatmul.msk.f32.gmra.mxu1 %vm342_vm1, %v3628_v16  ;;  %2349 = vmatmul.msk.f32.gmra.mxu2 %vm342_vm1, %v4392_v56  ;;  %v4400_v24 = vld [vmem:[#allocation16_spill] sm:$0xff]  ;;  %v4401_v56 = vld [vmem:[#allocation30_spill] sm:$0xff] }
 0x21d   : > { %1976 = vst.msk [vmem:[%s3958_s27 + $0x30] sm:$0xff] %vm342_vm1, %v1944_v10  ;;  %2389 = vmatmul.msk.f32.gmra.mxu3 %vm342_vm1, %v4394_v2  ;;  %v1863_v13 = vpop.f32.mrf.mxu0 }
 0x21e   : > { %v1536_v34 = vpop.f32.mrf.mxu2 }
 0x21f   : > { %v1618_v26 = vadd.f32 %v1536_v34, %v1458_v49 }
 0x220   : > { %v1379_v42 = vpop.f32.mrf.mxu1  ;;  %v1700_v12 = vpop.f32.mrf.mxu3  ;;  %2429 = vmatmul.msk.f32.gmra.mxu0 %vm342_vm1, %v4395_v27 }
 0x221   : > { %v1782_v16 = vadd.f32 %v1700_v12, %v1618_v26  ;;  %v1459_v57 = vadd.f32 %v1379_v42, %v4396_v32  ;;  %v2536_v42 = vld [vmem:[%s2689_s14 + $0x170] sm:$0xff]  ;;  %v4402_v12 = vld [vmem:[#allocation17_spill] sm:$0xff] }
 0x223   : > { %v1945_v45 = vadd.f32 %v1863_v13, %v1782_v16  ;;  %2310 = vmatmul.msk.f32.gmra.mxu1 %vm342_vm1, %v4391_v37  ;;  %2350 = vmatmul.msk.f32.gmra.mxu2 %vm342_vm1, %v2533_v40  ;;  %v2535_v37 = vld [vmem:[%s2689_s14 + $0x168] sm:$0xff]  ;;  %v4403_v16 = vld [vmem:[#allocation32_spill] sm:$0xff] }
 0x225   : > { %1977 = vst.msk [vmem:[%s3958_s27 + $0x38] sm:$0xff] %vm342_vm1, %v1945_v45  ;;  %2390 = vmatmul.msk.f32.gmra.mxu3 %vm342_vm1, %v4397_v38  ;;  %v1866_v17 = vpop.f32.mrf.mxu0 }
 0x226   : > { %v1539_v62 = vpop.f32.mrf.mxu2 }
 0x227   : > { %v1619_v61 = vadd.f32 %v1539_v62, %v1459_v57 }
 0x228   : > { %v1382_v30 = vpop.f32.mrf.mxu1  ;;  %v1703_v18 = vpop.f32.mrf.mxu3  ;;  %2430 = vmatmul.msk.f32.gmra.mxu0 %vm342_vm1, %v3684_v14 }
 0x229   : > { %v1783_v33 = vadd.f32 %v1703_v18, %v1619_v61  ;;  %v1460_v25 = vadd.f32 %v1382_v30, %v4398_v4  ;;  %v4404_v30 = vld [vmem:[#allocation20_spill] sm:$0xff] }
 0x22b   : > { %v1946_v20 = vadd.f32 %v1866_v17, %v1783_v33  ;;  %2311 = vmatmul.msk.f32.gmra.mxu1 %vm342_vm1, %v4395_v27  ;;  %2351 = vmatmul.msk.f32.gmra.mxu2 %vm342_vm1, %v2534_v50  ;;  %v1321_v17 = vrot.slane %v3715_v28, 2 }
 0x22d   : > { %1978 = vst.msk [vmem:[%s3958_s27 + $0x40] sm:$0xff] %vm342_vm1, %v1946_v20  ;;  %2391 = vmatmul.msk.f32.gmra.mxu3 %vm342_vm1, %v4399_v19  ;;  %v1869_v53 = vpop.f32.mrf.mxu0  ;;  %v1323_v19 = vrot.slane %v3741_v11, 2 }
 0x22e   : > { %v1542_v52 = vpop.f32.mrf.mxu2 }
 0x22f   : > { %v1620_v55 = vadd.f32 %v1542_v52, %v1460_v25  ;;  %v194_v52 = vld [vmem:[%s2689_s14 + $0x1a0] sm:$0xff]  ;;  %v1324_v11 = vsel %vm697_vm2, %v1321_v17, %v1323_v19 }
 0x230   : > { %v1385_v1 = vpop.f32.mrf.mxu1  ;;  %v1706_v43 = vpop.f32.mrf.mxu3  ;;  %2431 = vmatmul.msk.f32.gmra.mxu0 %vm342_vm1, %v3699_v21 }
 0x231   : > { %v1784_v8 = vadd.f32 %v1706_v43, %v1620_v55  ;;  %v1461_v10 = vadd.f32 %v1385_v1, %v4400_v24  ;;  %v4405_v55 = vld [vmem:[#allocation25_spill] sm:$0xff] }
 0x233   : > { %v1947_v47 = vadd.f32 %v1869_v53, %v1784_v8  ;;  %2312 = vmatmul.msk.f32.gmra.mxu1 %vm342_vm1, %v3684_v14  ;;  %2352 = vmatmul.msk.f32.gmra.mxu2 %vm342_vm1, %v2535_v37 }
 0x235   : > { %1979 = vst.msk [vmem:[%s3958_s27 + $0x48] sm:$0xff] %vm342_vm1, %v1947_v47  ;;  %2392 = vmatmul.msk.f32.gmra.mxu3 %vm342_vm1, %v4401_v56  ;;  %v1872_v46 = vpop.f32.mrf.mxu0 }
 0x236   : > { %v1545_v49 = vpop.f32.mrf.mxu2 }
 0x237   : > { %v1621_v2 = vadd.f32 %v1545_v49, %v1461_v10 }
 0x238   : > { %v1388_v13 = vpop.f32.mrf.mxu1  ;;  %v1709_v34 = vpop.f32.mrf.mxu3  ;;  %2432 = vmatmul.msk.f32.gmra.mxu0 %vm342_vm1, %v3718_v15 }
 0x239   : > { %v1785_v14 = vadd.f32 %v1709_v34, %v1621_v2  ;;  %v1462_v27 = vadd.f32 %v1388_v13, %v4402_v12 }
 0x23b   : > { %v1948_v26 = vadd.f32 %v1872_v46, %v1785_v14  ;;  %2313 = vmatmul.msk.f32.gmra.mxu1 %vm342_vm1, %v3699_v21  ;;  %2353 = vmatmul.msk.f32.gmra.mxu2 %vm342_vm1, %v2536_v42  ;;  %v1320_v21 = vrot.slane %v3721_v63, 2  ;;  %v1808_v46 = vrot.slane %v194_v52, 2 }
 0x23d   : > { %1980 = vst.msk [vmem:[%s3958_s27 + $0x50] sm:$0xff] %vm342_vm1, %v1948_v26  ;;  %2393 = vmatmul.msk.f32.gmra.mxu3 %vm342_vm1, %v4403_v16  ;;  %v1875_v45 = vpop.f32.mrf.mxu0  ;;  %v1322_v20 = vsel %vm697_vm2, %v1320_v21, %v1321_v17 }
 0x23e   : > { %v1548_v40 = vpop.f32.mrf.mxu2 }
 0x23f   : > { %v1622_v32 = vadd.f32 %v1548_v40, %v1462_v27 }
 0x240   : > { %v1391_v57 = vpop.f32.mrf.mxu1  ;;  %v1712_v38 = vpop.f32.mrf.mxu3  ;;  %2433 = vmatmul.msk.f32.gmra.mxu0 %vm342_vm1, %v3744_v59 }
 0x241   : > { %v1786_v62 = vadd.f32 %v1712_v38, %v1622_v32  ;;  %v1463_v18 = vadd.f32 %v1391_v57, %v4404_v30 }
 0x243   : > { %v1949_v61 = vadd.f32 %v1875_v45, %v1786_v62  ;;  %2314 = vmatmul.msk.f32.gmra.mxu1 %vm342_vm1, %v3718_v15  ;;  %2354 = vmatmul.msk.f32.gmra.mxu2 %vm342_vm1, %v3721_v63 }
 0x245   : > { %1981 = vst.msk [vmem:[%s3958_s27 + $0x58] sm:$0xff] %vm342_vm1, %v1949_v61  ;;  %2394 = vmatmul.msk.f32.gmra.mxu3 %vm342_vm1, %v3738_v7  ;;  %v1878_v33 = vpop.f32.mrf.mxu0  ;;  %v193_v7 = vld [vmem:[%s2689_s14 + $0x198] sm:$0xff] }
 0x246   : > { %v1551_v50 = vpop.f32.mrf.mxu2  ;;  %v1644_v47 = vrot.slane %v193_v7, 1  ;;  %v1807_v56 = vrot.slane %v193_v7, 2 }
 0x247   : > { %v1623_v4 = vadd.f32 %v1551_v50, %v1463_v18 }
 0x248   : > { %v1394_v25 = vpop.f32.mrf.mxu1  ;;  %v1715_v15 = vpop.f32.mrf.mxu3  ;;  %2434 = vmatmul.msk.f32.gmra.mxu0 %vm342_vm1, %v1322_v20  ;;  %v1809_v14 = vsel %vm697_vm2, %v1807_v56, %v1808_v46 }
 0x249   : > { %v1787_v63 = vadd.f32 %v1715_v15, %v1623_v4  ;;  %v1464_v1 = vadd.f32 %v1394_v25, %v4405_v55 }
 0x24b   : > { %v1950_v53 = vadd.f32 %v1878_v33, %v1787_v63  ;;  %2315 = vmatmul.msk.f32.gmra.mxu1 %vm342_vm1, %v3744_v59  ;;  %2355 = vmatmul.msk.f32.gmra.mxu2 %vm342_vm1, %v3715_v28  ;;  %v1645_v59 = vrot.slane %v194_v52, 1 }
 0x24d   : > { %1982 = vst.msk [vmem:[%s3958_s27 + $0x60] sm:$0xff] %vm342_vm1, %v1950_v53  ;;  %2395 = vmatmul.msk.f32.gmra.mxu3 %vm342_vm1, %v3759_v58  ;;  %v1881_v43 = vpop.f32.mrf.mxu0  ;;  %v1646_v49 = vsel %vm252_vm0, %v1644_v47, %v1645_v59  ;;  %v195_v58 = vld [vmem:[%s2689_s14 + $0x1a8] sm:$0x3]  ;;  %s2443_s14 = sshll.u32 %s2639_s13, 8  ;;  %s2003_s13 = scalar_lea.sflag [#allocation3], %s134_s25 }
 0x24e   : > { %v1554_v8 = vpop.f32.mrf.mxu2  ;;  %v1647_v42 = vrot.slane %v195_v58, 1  ;;  %v1810_v40 = vrot.slane %v195_v58, 2  ;;  %s2014_s30 = scalar_lea.hbm %s4208_s2, %s2443_s14 }
 0x24f   : > { %v1624_v37 = vadd.f32 %v1554_v8, %v1464_v1  ;;  %s2017_s4 = sshll.u32 %s2014_s30, 4  ;;  %s2018_s4 = int_to_ptr.hbm [resolvable:$true] %s2017_s4 }
 0x250   : > { %v1397_v24 = vpop.f32.mrf.mxu1  ;;  %v1718_v28 = vpop.f32.mrf.mxu3  ;;  %2435 = vmatmul.msk.f32.gmra.mxu0 %vm342_vm1, %v1324_v11  ;;  %v1648_v32 = vsel %vm252_vm0, %v1645_v59, %v1647_v42  ;;  %v1811_v21 = vsel %vm697_vm2, %v1808_v46, %v1810_v40  ;;  %s2551_s5 = sshra.s32 %s2018_s4, 4  ;;  %s2552_s5 = int_to_ptr.hbm [resolvable:$true] %s2551_s5 }
 0x251   : > { %v1788_v10 = vadd.f32 %v1718_v28, %v1624_v37  ;;  %v1465_v13 = vadd.f32 %v1397_v24, %v3749_v36  ;;  %s2553_s6 = scalar_lea.hbm %s2552_s5, 256  ;;  %p2558_p0 = scmp.lt.s32.totalorder %s2552_s5, %s4208_s2 }
 0x252   : > { %p2554_p11 = scmp.ne.s32.totalorder %s2552_s5, %s2553_s6  ;;  %p2559_p1 = scmp.lt.s32.totalorder %s2557_s16, %s2553_s6 }
 0x253   : > { %v1951_v2 = vadd.f32 %v1881_v43, %v1788_v10  ;;  %2316 = vmatmul.msk.f32.gmra.mxu1 %vm342_vm1, %v1322_v20  ;;  %2356 = vmatmul.msk.f32.gmra.mxu2 %vm342_vm1, %v193_v7 }
 0x254   : > { %p2555_p12 = pnand %p2554_p11, %p2656_p5  ;;  %p2560_p2 = por %p2559_p1, %p2558_p0 }
 0x255   : > { %1983 = vst.msk [vmem:[%s3958_s27 + $0x68] sm:$0xff] %vm342_vm1, %v1951_v2  ;;  %2396 = vmatmul.msk.f32.gmra.mxu3 %vm342_vm1, %v1646_v49  ;;  %v1884_v34 = vpop.f32.mrf.mxu0 }
 0x256   : > { %v1557_v26 = vpop.f32.mrf.mxu2  ;;  %p2556_p13 = pneg %p2555_p12 }
 0x257   : > { %v1625_v12 = vadd.f32 %v1557_v26, %v1465_v13 }
 0x258   : > { %v1400_v27 = vpop.f32.mrf.mxu1  ;;  %v1721_v16 = vpop.f32.mrf.mxu3  ;;  %2436 = vmatmul.msk.f32.gmra.mxu0 %vm342_vm1, %v1809_v14  ;;  %p2561_p3 = pnand %p2560_p2, %p2556_p13 }
 0x259   : > { %v1789_v45 = vadd.f32 %v1721_v16, %v1625_v12  ;;  %v1466_v57 = vadd.f32 %v1400_v27, %v3763_v3 }
 0x25b   : > { %v1952_v36 = vadd.f32 %v1884_v34, %v1789_v45  ;;  %2317 = vmatmul.msk.f32.gmra.mxu1 %vm342_vm1, %v1324_v11  ;;  %2357 = vmatmul.msk.f32.gmra.mxu2 %vm342_vm1, %v194_v52 }
 0x25d   : > { %1984 = vst.msk [vmem:[%s3958_s27 + $0x70] sm:$0xff] %vm342_vm1, %v1952_v36  ;;  %2397 = vmatmul.msk.f32.gmra.mxu3 %vm342_vm1, %v1648_v32  ;;  %v1887_v38 = vpop.f32.mrf.mxu0 }
 0x25e   : > { %v1560_v17 = vpop.f32.mrf.mxu2 }
 0x25f   : > { %v1626_v62 = vadd.f32 %v1560_v17, %v1466_v57 }
 0x260   : > { %v1403_v61 = vpop.f32.mrf.mxu1  ;;  %v1724_v30 = vpop.f32.mrf.mxu3  ;;  %2437 = vmatmul.msk.f32.gmra.mxu0 %vm342_vm1, %v1811_v21 }
 0x261   : > { %v1790_v18 = vadd.f32 %v1724_v30, %v1626_v62  ;;  %v1467_v20 = vadd.f32 %v1403_v61, %v3774_v23 }
 0x263   : > { %v1953_v33 = vadd.f32 %v1887_v38, %v1790_v18 }
 0x265   : > { %1985 = vst.msk [vmem:[%s3958_s27 + $0x78] sm:$0xff] %vm342_vm1, %v1953_v33  ;;  %v1890_v3 = vpop.f32.mrf.mxu0 }
 0x266   : > { %v1563_v50 = vpop.f32.mrf.mxu2 }
 0x267   : > { %v1627_v4 = vadd.f32 %v1563_v50, %v1467_v20 }
 0x268   : > { %v1406_v25 = vpop.f32.mrf.mxu1  ;;  %v1727_v15 = vpop.f32.mrf.mxu3 }
 0x269   : > { %v1791_v63 = vadd.f32 %v1727_v15, %v1627_v4  ;;  %v1468_v53 = vadd.f32 %v1406_v25, %v3785_v51 }
 0x26b   : > { %v1954_v19 = vadd.f32 %v1890_v3, %v1791_v63 }
 0x26d   : > { %1986 = vst.msk [vmem:[%s3958_s27 + $0x80] sm:$0xff] %vm342_vm1, %v1954_v19  ;;  %v1893_v7 = vpop.f32.mrf.mxu0 }
 0x26e   : > { %v1566_v52 = vpop.f32.mrf.mxu2 }
 0x26f   : > { %v1628_v55 = vadd.f32 %v1566_v52, %v1468_v53 }
 0x270   : > { %v1409_v1 = vpop.f32.mrf.mxu1  ;;  %v1730_v23 = vpop.f32.mrf.mxu3 }
 0x271   : > { %v1792_v43 = vadd.f32 %v1730_v23, %v1628_v55  ;;  %v1469_v8 = vadd.f32 %v1409_v1, %v3796_v9 }
 0x273   : > { %v1955_v11 = vadd.f32 %v1893_v7, %v1792_v43 }
 0x275   : > { %1987 = vst.msk [vmem:[%s3958_s27 + $0x88] sm:$0xff] %vm342_vm1, %v1955_v11  ;;  %v1896_v47 = vpop.f32.mrf.mxu0 }
 0x276   : > { %v1569_v59 = vpop.f32.mrf.mxu2 }
 0x277   : > { %v1629_v37 = vadd.f32 %v1569_v59, %v1469_v8 }
 0x278   : > { %v1412_v24 = vpop.f32.mrf.mxu1  ;;  %v1733_v51 = vpop.f32.mrf.mxu3 }
 0x279   : > { %v1793_v28 = vadd.f32 %v1733_v51, %v1629_v37  ;;  %v1470_v56 = vadd.f32 %v1412_v24, %v3807_v48 }
 0x27b   : > { %v1956_v10 = vadd.f32 %v1896_v47, %v1793_v28 }
 0x27d   : > { %1988 = vst.msk [vmem:[%s3958_s27 + $0x90] sm:$0xff] %vm342_vm1, %v1956_v10  ;;  %v1899_v46 = vpop.f32.mrf.mxu0 }
 0x27e   : > { %v1572_v49 = vpop.f32.mrf.mxu2 }
 0x27f   : > { %v1630_v2 = vadd.f32 %v1572_v49, %v1470_v56 }
 0x280   : > { %v1415_v58 = vpop.f32.mrf.mxu1  ;;  %v1736_v9 = vpop.f32.mrf.mxu3 }
 0x281   : > { %v1794_v13 = vadd.f32 %v1736_v9, %v1630_v2  ;;  %v1471_v14 = vadd.f32 %v1415_v58, %v3818_v35 }
 0x283   : > { %v1957_v34 = vadd.f32 %v1899_v46, %v1794_v13 }
 0x285   : > { %1989 = vst.msk [vmem:[%s3958_s27 + $0x98] sm:$0xff] %vm342_vm1, %v1957_v34  ;;  %v1902_v26 = vpop.f32.mrf.mxu0 }
 0x286   : > { %v1575_v42 = vpop.f32.mrf.mxu2 }
 0x287   : > { %v1631_v12 = vadd.f32 %v1575_v42, %v1471_v14 }
 0x288   : > { %v1418_v27 = vpop.f32.mrf.mxu1  ;;  %v1739_v48 = vpop.f32.mrf.mxu3 }
 0x289   : > { %v1795_v16 = vadd.f32 %v1739_v48, %v1631_v12  ;;  %v1472_v40 = vadd.f32 %v1418_v27, %v3829_v41 }
 0x28b   : > { %v1958_v45 = vadd.f32 %v1902_v26, %v1795_v16 }
 0x28d   : > { %1990 = vst.msk [vmem:[%s3958_s27 + $0xa0] sm:$0xff] %vm342_vm1, %v1958_v45  ;;  %v1905_v32 = vpop.f32.mrf.mxu0 }
 0x28e   : > { %v1578_v36 = vpop.f32.mrf.mxu2 }
 0x28f   : > { %v1632_v57 = vadd.f32 %v1578_v36, %v1472_v40 }
 0x290   : > { %v1421_v38 = vpop.f32.mrf.mxu1  ;;  %v1742_v35 = vpop.f32.mrf.mxu3 }
 0x291   : > { %v1796_v21 = vadd.f32 %v1742_v35, %v1632_v57  ;;  %v1473_v62 = vadd.f32 %v1421_v38, %v3840_v54 }
 0x293   : > { %v1959_v17 = vadd.f32 %v1905_v32, %v1796_v21 }
 0x295   : > { %1991 = vst.msk [vmem:[%s3958_s27 + $0xa8] sm:$0xff] %vm342_vm1, %v1959_v17  ;;  %v1908_v61 = vpop.f32.mrf.mxu0 }
 0x296   : > { %v1581_v30 = vpop.f32.mrf.mxu2 }
 0x297   : > { %v1633_v18 = vadd.f32 %v1581_v30, %v1473_v62 }
 0x298   : > { %v1424_v33 = vpop.f32.mrf.mxu1  ;;  %v1745_v41 = vpop.f32.mrf.mxu3 }
 0x299   : > { %v1797_v20 = vadd.f32 %v1745_v41, %v1633_v18  ;;  %v1474_v50 = vadd.f32 %v1424_v33, %v3851_v39 }
 0x29b   : > { %v1960_v3 = vadd.f32 %v1908_v61, %v1797_v20 }
 0x29d   : > { %1992 = vst.msk [vmem:[%s3958_s27 + $0xb0] sm:$0xff] %vm342_vm1, %v1960_v3  ;;  %v1911_v4 = vpop.f32.mrf.mxu0 }
 0x29e   : > { %v1584_v25 = vpop.f32.mrf.mxu2 }
 0x29f   : > { %v1634_v15 = vadd.f32 %v1584_v25, %v1474_v50 }
 0x2a0   : > { %v1427_v63 = vpop.f32.mrf.mxu1  ;;  %v1748_v54 = vpop.f32.mrf.mxu3 }
 0x2a1   : > { %v1798_v19 = vadd.f32 %v1748_v54, %v1634_v15  ;;  %v1475_v7 = vadd.f32 %v1427_v63, %v3862_v0 }
 0x2a3   : > { %v1961_v53 = vadd.f32 %v1911_v4, %v1798_v19 }
 0x2a5   : > { %1993 = vst.msk [vmem:[%s3958_s27 + $0xb8] sm:$0xff] %vm342_vm1, %v1961_v53  ;;  %v1914_v52 = vpop.f32.mrf.mxu0 }
 0x2a6   : > { %v1587_v55 = vpop.f32.mrf.mxu2 }
 0x2a7   : > { %v1635_v1 = vadd.f32 %v1587_v55, %v1475_v7 }
 0x2a8   : > { %v1430_v23 = vpop.f32.mrf.mxu1  ;;  %v1751_v39 = vpop.f32.mrf.mxu3 }
 0x2a9   : > { %v1799_v43 = vadd.f32 %v1751_v39, %v1635_v1  ;;  %v1476_v8 = vadd.f32 %v1430_v23, %v3873_v22 }
 0x2ab   : > { %v1962_v11 = vadd.f32 %v1914_v52, %v1799_v43 }
 0x2ad   : > { %1994 = vst.msk [vmem:[%s3958_s27 + $0xc0] sm:$0xff] %vm342_vm1, %v1962_v11  ;;  %v1917_v47 = vpop.f32.mrf.mxu0 }
 0x2ae   : > { %v1590_v59 = vpop.f32.mrf.mxu2 }
 0x2af   : > { %v1636_v37 = vadd.f32 %v1590_v59, %v1476_v8 }
 0x2b0   : > { %v1433_v24 = vpop.f32.mrf.mxu1  ;;  %v1754_v0 = vpop.f32.mrf.mxu3 }
 0x2b1   : > { %v1800_v51 = vadd.f32 %v1754_v0, %v1636_v37  ;;  %v1477_v10 = vadd.f32 %v1433_v24, %v3884_v31 }
 0x2b3   : > { %v1963_v28 = vadd.f32 %v1917_v47, %v1800_v51 }
 0x2b5   : > { %1995 = vst.msk [vmem:[%s3958_s27 + $0xc8] sm:$0xff] %vm342_vm1, %v1963_v28  ;;  %v1920_v56 = vpop.f32.mrf.mxu0 }
 0x2b6   : > { %v1593_v46 = vpop.f32.mrf.mxu2 }
 0x2b7   : > { %v1637_v49 = vadd.f32 %v1593_v46, %v1477_v10 }
 0x2b8   : > { %v1436_v2 = vpop.f32.mrf.mxu1  ;;  %v1757_v22 = vpop.f32.mrf.mxu3 }
 0x2b9   : > { %v1801_v58 = vadd.f32 %v1757_v22, %v1637_v49  ;;  %v1478_v13 = vadd.f32 %v1436_v2, %v3895_v44 }
 0x2bb   : > { %v1964_v9 = vadd.f32 %v1920_v56, %v1801_v58 }
 0x2bd   : > { %1996 = vst.msk [vmem:[%s3958_s27 + $0xd0] sm:$0xff] %vm342_vm1, %v1964_v9  ;;  %v1923_v34 = vpop.f32.mrf.mxu0 }
 0x2be   : > { %v1596_v14 = vpop.f32.mrf.mxu2 }
 0x2bf   : > { %v1638_v26 = vadd.f32 %v1596_v14, %v1478_v13 }
 0x2c0   : > { %v1439_v42 = vpop.f32.mrf.mxu1  ;;  %v1760_v31 = vpop.f32.mrf.mxu3 }
 0x2c1   : > { %v1802_v12 = vadd.f32 %v1760_v31, %v1638_v26  ;;  %v1479_v48 = vadd.f32 %v1439_v42, %v3906_v6 }
 0x2c3   : > { %v1965_v27 = vadd.f32 %v1923_v34, %v1802_v12 }
 0x2c5   : > { %1997 = vst.msk [vmem:[%s3958_s27 + $0xd8] sm:$0xff] %vm342_vm1, %v1965_v27  ;;  %v1926_v16 = vpop.f32.mrf.mxu0 }
 0x2c6   : > { %v1599_v45 = vpop.f32.mrf.mxu2 }
 0x2c7   : > { %v1639_v40 = vadd.f32 %v1599_v45, %v1479_v48 }
 0x2c8   : > { %v1442_v32 = vpop.f32.mrf.mxu1  ;;  %v1763_v44 = vpop.f32.mrf.mxu3 }
 0x2c9   : > { %v1803_v36 = vadd.f32 %v1763_v44, %v1639_v40  ;;  %v1480_v38 = vadd.f32 %v1442_v32, %v3917_v5 }
 0x2cb   : > { %v1966_v57 = vadd.f32 %v1926_v16, %v1803_v36 }
 0x2cd   : > { %1998 = vst.msk [vmem:[%s3958_s27 + $0xe0] sm:$0xff] %vm342_vm1, %v1966_v57  ;;  %v1929_v35 = vpop.f32.mrf.mxu0 }
 0x2ce   : > { %v1602_v21 = vpop.f32.mrf.mxu2 }
 0x2cf   : > { %v1640_v17 = vadd.f32 %v1602_v21, %v1480_v38 }
 0x2d0   : > { %v1445_v62 = vpop.f32.mrf.mxu1  ;;  %v1766_v6 = vpop.f32.mrf.mxu3 }
 0x2d1   : > { %v1804_v61 = vadd.f32 %v1766_v6, %v1640_v17  ;;  %v1481_v18 = vadd.f32 %v1445_v62, %v3928_v29 }
 0x2d3   : > { %v1967_v30 = vadd.f32 %v1929_v35, %v1804_v61 }
 0x2d5   : > { %1999 = vst.msk [vmem:[%s3958_s27 + $0xe8] sm:$0xff] %vm342_vm1, %v1967_v30  ;;  %v1932_v41 = vpop.f32.mrf.mxu0 }
 0x2d6   : > { %v1605_v33 = vpop.f32.mrf.mxu2 }
 0x2d7   : > { %v1641_v20 = vadd.f32 %v1605_v33, %v1481_v18 }
 0x2d8   : > { %v1769_v5 = vpop.f32.mrf.mxu3  ;;  %v1448_v50 = vpop.f32.mrf.mxu1 }
 0x2d9   : > { %v1805_v3 = vadd.f32 %v1769_v5, %v1641_v20  ;;  %v1482_v25 = vadd.f32 %v1448_v50, %v3939_v60 }
 0x2db   : > { %v1968_v4 = vadd.f32 %v1932_v41, %v1805_v3 }
 0x2dd   : > { %2000 = vst.msk [vmem:[%s3958_s27 + $0xf0] sm:$0xff] %vm342_vm1, %v1968_v4  ;;  %v1935_v54 = vpop.f32.mrf.mxu0 }
 0x2de   : > { %v1608_v29 = vpop.f32.mrf.mxu2 }
 0x2df   : > { %v1642_v15 = vadd.f32 %v1608_v29, %v1482_v25 }
 0x2e0   : > { %v1772_v63 = vpop.f32.mrf.mxu3 }
 0x2e1   : > { %v1806_v19 = vadd.f32 %v1772_v63, %v1642_v15 }
 0x2e3   : > { %v1969_v53 = vadd.f32 %v1935_v54, %v1806_v19 }
 0x2e5   : > { %2001 = vst.msk [vmem:[%s3958_s27 + $0xf8] sm:$0xff] %vm342_vm1, %v1969_v53 }
 0x2e6   : > { %2564 = shalt.err (!%p2561_p3)
}
 0x2e7   : > { %s2601_s22 = smov 128   ;;  %s2602_s23 = smov 8  }
 0x2e8   : > { %2469 = dma.vmem_to_hbm [thread:$0]  (%p2656_p5), %s2016_s3, 4096, %s2018_s4, %s2003_s13, %s2601_s22, %s2601_s22, %s2602_s23  }
 0x2e9 PF: > { %p2475_p4 = scmp.ge.s32.totalorder %s2599_s12, 2  ;;  %s2032_s24 = sand.u32 1, %s2587_s9  }
 0x2ea   : > { %s2033_s25 = scalar_lea.sflag [#allocation3], %s2032_s24 }
 0x2eb   : > { %p2472_p7 = pnand %p2475_p4, %p2660_p6 }
 0x2ed   : > { %p2473_p8 = pneg %p2472_p7 }
 0x2ef   : > { %2582 = dma.done.wait (%p2473_p8), %s2033_s25, 4096  }
 0x2f0   : > { %2584 = vsyncadd (%p2473_p8), %s2033_s25, 4294963200  ;;  %p12_p9 = scmp.ge.s32.totalorder %s2643_s15, 4   ;;  %s4406_s9 = smov %s2591_s10 }
 0x2f1   : > { %s4407_s10 = smov %s2595_s11  ;;  %s4408_s11 = smov %s2654_s18 }
 0x2f2   : > { %s4409_s12 = smov %s2643_s15  ;;  %14 = sbr.rel (!%p12_p9) target bundleno = 3 (0x3), region = 71 }
 0x2f7   :  { %2039 = vsyncpa [#allocation3], 1 }
 0x2f8   :  { %2041 = vsyncpa [#allocation3 + $0x1], 1 }

</bundles_post_ra>
